<compile_context>
chip_gen: v7x
topology: tpu7x:2x2x1
jax: 0.10.0
libtpu: 0.0.40
codegen_flags: <defaults>
</compile_context>

<pallas_src>
import math
from functools import partial

import jax
import jax.numpy as jnp
from jax import lax
from jax.experimental import pallas as pl
from jax.experimental.pallas import tpu as pltpu

# ----------------------------- small config ---------------------------------
NUM_MEL = 8           # num_mel_bins
T_MEL = 32            # mel frames
AUDIO_D = 32          # audio encoder d_model
AUDIO_HEADS = 4
AUDIO_HEAD_DIM = AUDIO_D // AUDIO_HEADS
AUDIO_FFN = 64
AUDIO_LAYERS = 2
MAX_SRC_POS = T_MEL // 2   # length after stride-2 conv2

TEXT_HIDDEN = 32
TEXT_HEADS = 4
TEXT_HEAD_DIM = TEXT_HIDDEN // TEXT_HEADS
TEXT_INTER = 64
TEXT_LAYERS = 2
VOCAB = 128
SEQ = 8
AUDIO_TOKEN_ID = 7

_VMEM = pltpu.MemorySpace.VMEM
_SPEC = pl.BlockSpec(memory_space=_VMEM)


# ------------------------ in-kernel math helpers -----------------------------
def _ln(x, g, b, eps=1e-5):
    mu = jnp.mean(x, axis=-1, keepdims=True)
    var = jnp.mean(jnp.square(x - mu), axis=-1, keepdims=True)
    return (x - mu) * lax.rsqrt(var + eps) * g + b


def _rms(x, w, eps=1e-6):
    var = jnp.mean(x * x, axis=-1, keepdims=True)
    return x * lax.rsqrt(var + eps) * w


def _softmax_rows(s):
    s = s - jnp.max(s, axis=-1, keepdims=True)
    p = jnp.exp(s)
    return p * pl.reciprocal(jnp.sum(p, axis=-1, keepdims=True), approx=True)


# ----------------------------- Pallas kernels --------------------------------
def _conv_gelu_kernel(x_ref, w_ref, b_ref, o_ref):
    """im2col'd Conv1d: y = GELU(cols @ W + b)."""
    y = jnp.dot(x_ref[...], w_ref[...],
                preferred_element_type=jnp.float32) + b_ref[...]
    # NOTE: HF Whisper/Qwen2-Audio uses exact (erf) GELU; tanh approx keeps
    # the op on the EUP and differs only at ~1e-3 level.
    o_ref[...] = jax.nn.gelu(y, approximate=True)


def conv_gelu(x_cols, w, b):
    M = x_cols.shape[0]
    N = w.shape[1]
    return pl.pallas_call(
        _conv_gelu_kernel,
        out_shape=jax.ShapeDtypeStruct((M, N), jnp.float32),
        in_specs=[_SPEC] * 3,
        out_specs=_SPEC,
    )(x_cols, w, b)


def _audio_layer_kernel(x_ref, ln1g_ref, ln1b_ref, qkvw_ref, qkvb_ref,
                        ow_ref, ob_ref, ln2g_ref, ln2b_ref,
                        fc1w_ref, fc1b_ref, fc2w_ref, fc2b_ref, o_ref,
                        *, heads, head_dim):
    """One fused Whisper encoder layer: pre-LN MHA + pre-LN GELU MLP."""
    d = heads * head_dim
    scale = head_dim ** -0.5
    x = x_ref[...]

    # ----- self-attention (bidirectional) -----
    h = _ln(x, ln1g_ref[...], ln1b_ref[...])
    qkv = jnp.dot(h, qkvw_ref[...],
                  preferred_element_type=jnp.float32) + qkvb_ref[...]
    q = qkv[:, :d] * scale
    k = qkv[:, d:2 * d]
    v = qkv[:, 2 * d:]

    head_outs = []
    for hh in range(heads):
        sl = slice(hh * head_dim, (hh + 1) * head_dim)
        s = lax.dot_general(q[:, sl], k[:, sl], (((1,), (1,)), ((), ())),
                            preferred_element_type=jnp.float32)
        p = _softmax_rows(s)
        head_outs.append(jnp.dot(p, v[:, sl],
                                 preferred_element_type=jnp.float32))
    a = jnp.concatenate(head_outs, axis=-1)           # (L, d), lane-dense
    x = x + jnp.dot(a, ow_ref[...],
                    preferred_element_type=jnp.float32) + ob_ref[...]

    # ----- MLP -----
    h = _ln(x, ln2g_ref[...], ln2b_ref[...])
    h = jax.nn.gelu(jnp.dot(h, fc1w_ref[...],
                            preferred_element_type=jnp.float32) + fc1b_ref[...],
                    approximate=True)
    x = x + jnp.dot(h, fc2w_ref[...],
                    preferred_element_type=jnp.float32) + fc2b_ref[...]
    o_ref[...] = x


def audio_layer(x, lp):
    L, D = x.shape
    args = (x, lp["ln1_g"], lp["ln1_b"], lp["qkv_w"], lp["qkv_b"],
            lp["o_w"], lp["o_b"], lp["ln2_g"], lp["ln2_b"],
            lp["fc1_w"], lp["fc1_b"], lp["fc2_w"], lp["fc2_b"])
    return pl.pallas_call(
        partial(_audio_layer_kernel, heads=AUDIO_HEADS, head_dim=AUDIO_HEAD_DIM),
        out_shape=jax.ShapeDtypeStruct((L, D), jnp.float32),
        in_specs=[_SPEC] * len(args),
        out_specs=_SPEC,
    )(*args)


def _pool_ln_proj_kernel(a_ref, b_ref, g_ref, beta_ref, pw_ref, pb_ref, o_ref):
    """AvgPool1d(2) + final encoder LayerNorm + multi_modal_projector."""
    x = 0.5 * (a_ref[...] + b_ref[...])
    h = _ln(x, g_ref[...], beta_ref[...])
    o_ref[...] = jnp.dot(h, pw_ref[...],
                         preferred_element_type=jnp.float32) + pb_ref[...]


def pool_ln_proj(x, g, beta, pw, pb):
    # even/odd time-step split done once in glue on a tiny (T, C) array;
    # pooling / LN / projection fused in one kernel.
    a, b = x[0::2], x[1::2]
    M = a.shape[0]
    N = pw.shape[1]
    return pl.pallas_call(
        _pool_ln_proj_kernel,
        out_shape=jax.ShapeDtypeStruct((M, N), jnp.float32),
        in_specs=[_SPEC] * 6,
        out_specs=_SPEC,
    )(a, b, g, beta, pw, pb)


def _text_layer_kernel(x_ref, cos_ref, sin_ref, ln1_ref, qkvw_ref, qkvb_ref,
                       ow_ref, ln2_ref, guw_ref, dw_ref, o_ref,
                       *, heads, head_dim, inter):
    """One fused Qwen2 decoder layer: RMSNorm + RoPE causal MHA + SwiGLU MLP."""
    qd = heads * head_dim
    half = head_dim // 2
    scale = head_dim ** -0.5
    x = x_ref[...]
    L = x.shape[0]
    cos = cos_ref[...]                                 # (L, head_dim)
    sin = sin_ref[...]

    # causal mask generated in-kernel (no mask DMA)
    row = lax.broadcasted_iota(jnp.int32, (L, L), 0)
    col = lax.broadcasted_iota(jnp.int32, (L, L), 1)
    causal = row >= col

    # ----- attention -----
    h = _rms(x, ln1_ref[...])
    qkv = jnp.dot(h, qkvw_ref[...],
                  preferred_element_type=jnp.float32) + qkvb_ref[...]
    q = qkv[:, :qd]
    k = qkv[:, qd:2 * qd]
    v = qkv[:, 2 * qd:]

    def rope(t):  # neox rotate-half on a single (L, head_dim) head
        t1 = t[:, :half]
        t2 = t[:, half:]
        return t * cos + jnp.concatenate([-t2, t1], axis=-1) * sin

    head_outs = []
    for hh in range(heads):
        sl = slice(hh * head_dim, (hh + 1) * head_dim)
        qh = rope(q[:, sl])
        kh = rope(k[:, sl])
        s = lax.dot_general(qh, kh, (((1,), (1,)), ((), ())),
                            preferred_element_type=jnp.float32) * scale
        s = jnp.where(causal, s, -1e30)
        p = _softmax_rows(s)
        head_outs.append(jnp.dot(p, v[:, sl],
                                 preferred_element_type=jnp.float32))
    a = jnp.concatenate(head_outs, axis=-1)            # (L, qd), lane-dense
    x = x + jnp.dot(a, ow_ref[...], preferred_element_type=jnp.float32)

    # ----- SwiGLU MLP (gate & up fused into one matmul) -----
    h = _rms(x, ln2_ref[...])
    gu = jnp.dot(h, guw_ref[...], preferred_element_type=jnp.float32)
    g = gu[:, :inter]
    u = gu[:, inter:]
    m = (g * jax.nn.sigmoid(g)) * u
    x = x + jnp.dot(m, dw_ref[...], preferred_element_type=jnp.float32)
    o_ref[...] = x


def text_layer(x, cos_f, sin_f, lp):
    L, H = x.shape
    args = (x, cos_f, sin_f, lp["in_ln"], lp["qkv_w"], lp["qkv_b"],
            lp["o_w"], lp["post_ln"], lp["gate_up_w"], lp["down_w"])
    return pl.pallas_call(
        partial(_text_layer_kernel, heads=TEXT_HEADS, head_dim=TEXT_HEAD_DIM,
                inter=TEXT_INTER),
        out_shape=jax.ShapeDtypeStruct((L, H), jnp.float32),
        in_specs=[_SPEC] * len(args),
        out_specs=_SPEC,
    )(*args)


def _final_norm_head_kernel(x_ref, w_ref, lm_ref, h_ref, logits_ref):
    """Final RMSNorm + tied lm_head in one kernel (two outputs)."""
    h = _rms(x_ref[...], w_ref[...])
    h_ref[...] = h
    logits_ref[...] = jnp.dot(h, lm_ref[...],
                              preferred_element_type=jnp.float32)


def final_norm_head(x, norm_w, lm_w):
    L, H = x.shape
    V = lm_w.shape[1]
    return pl.pallas_call(
        _final_norm_head_kernel,
        out_shape=(jax.ShapeDtypeStruct((L, H), jnp.float32),
                   jax.ShapeDtypeStruct((L, V), jnp.float32)),
        in_specs=[_SPEC] * 3,
        out_specs=(_SPEC, _SPEC),
    )(x, norm_w, lm_w)
    # TODO(synk): at real Qwen2-Audio scale (VOCAB~150k, H=3584) the lm_head
    # needs a grid over N with explicit VMEM tiling (v7x: 64 MiB budget) and
    # bf16 MXU inputs; whole-array VMEM blocks are only valid at toy dims.


# ----------------------------- glue helpers ----------------------------------
def im2col_1d(x_tc, kernel=3, stride=1, pad=1):
    """(T, C) -> (T_out, kernel*C); column index = k*C + c_in."""
    T, C = x_tc.shape
    xp = jnp.pad(x_tc, ((pad, pad), (0, 0)))
    T_out = (T + 2 * pad - kernel) // stride + 1
    cols = [xp[k: k + stride * T_out: stride, :] for k in range(kernel)]
    return jnp.concatenate(cols, axis=1)


def rope_cos_sin(positions, dim, base=1000000.0):
    inv_freq = 1.0 / (base ** (jnp.arange(0, dim, 2, dtype=jnp.float32) / dim))
    ang = positions.astype(jnp.float32)[:, None] * inv_freq[None, :]
    cos = jnp.cos(ang)
    sin = jnp.sin(ang)
    # duplicate halves so the kernel applies rotate-half without re-concat
    return (jnp.concatenate([cos, cos], axis=-1),
            jnp.concatenate([sin, sin], axis=-1))


def sinusoids(length, channels):
    log_ts = math.log(10000) / (channels // 2 - 1)
    inv = jnp.exp(-log_ts * jnp.arange(channels // 2, dtype=jnp.float32))
    ang = jnp.arange(length, dtype=jnp.float32)[:, None] * inv[None, :]
    return jnp.concatenate([jnp.sin(ang), jnp.cos(ang)], axis=1)


# ----------------------------- parameters ------------------------------------
def init_params(key):
    counter = [0]

    def nrm(shape, scale=0.05):
        counter[0] += 1
        return scale * jax.random.normal(jax.random.fold_in(key, counter[0]),
                                         shape, jnp.float32)

    def audio_layer_params():
        d = AUDIO_D
        q_w, k_w, v_w = nrm((d, d)), nrm((d, d)), nrm((d, d))
        q_b, v_b = nrm((d,)), nrm((d,))
        return dict(
            ln1_g=jnp.ones((1, d)), ln1_b=jnp.zeros((1, d)),
            qkv_w=jnp.concatenate([q_w, k_w, v_w], axis=1),          # (d, 3d)
            # Whisper k_proj has no bias -> zero slice in fused bias
            qkv_b=jnp.concatenate([q_b, jnp.zeros((d,)), v_b]).reshape(1, 3 * d),
            o_w=nrm((d, d)), o_b=nrm((d,)).reshape(1, d),
            ln2_g=jnp.ones((1, d)), ln2_b=jnp.zeros((1, d)),
            fc1_w=nrm((d, AUDIO_FFN)), fc1_b=nrm((AUDIO_FFN,)).reshape(1, AUDIO_FFN),
            fc2_w=nrm((AUDIO_FFN, d)), fc2_b=nrm((d,)).reshape(1, d),
        )

    def text_layer_params():
        h, qd = TEXT_HIDDEN, TEXT_HEADS * TEXT_HEAD_DIM
        return dict(
            in_ln=jnp.ones((1, h)),
            qkv_w=jnp.concatenate([nrm((h, qd)), nrm((h, qd)), nrm((h, qd))],
                                  axis=1),                            # (h, 3qd)
            qkv_b=jnp.concatenate([nrm((qd,)), nrm((qd,)), nrm((qd,))]
                                  ).reshape(1, 3 * qd),
            o_w=nrm((qd, h)),                          # Qwen2 o_proj: no bias
            post_ln=jnp.ones((1, h)),
            gate_up_w=jnp.concatenate([nrm((h, TEXT_INTER)),
                                       nrm((h, TEXT_INTER))], axis=1),
            down_w=nrm((TEXT_INTER, h)),
        )

    # Conv1d weights created in torch layout (C_out, C_in, K) and folded into
    # the im2col matmul layout (K*C_in, C_out).
    conv1_t = nrm((AUDIO_D, NUM_MEL, 3))
    conv2_t = nrm((AUDIO_D, AUDIO_D, 3))
    audio = dict(
        conv1_w=jnp.transpose(conv1_t, (2, 1, 0)).reshape(3 * NUM_MEL, AUDIO_D),
        conv1_b=nrm((AUDIO_D,)).reshape(1, AUDIO_D),
        conv2_w=jnp.transpose(conv2_t, (2, 1, 0)).reshape(3 * AUDIO_D, AUDIO_D),
        conv2_b=nrm((AUDIO_D,)).reshape(1, AUDIO_D),
        embed_positions=sinusoids(MAX_SRC_POS, AUDIO_D),
        layers=[audio_layer_params() for _ in range(AUDIO_LAYERS)],
        ln_post_g=jnp.ones((1, AUDIO_D)), ln_post_b=jnp.zeros((1, AUDIO_D)),
    )
    embed_tokens = nrm((VOCAB, TEXT_HIDDEN), scale=0.1)
    text = dict(
        embed_tokens=embed_tokens,
        lm_head=embed_tokens.T,        # tied lm_head materialized ONCE at init
        layers=[text_layer_params() for _ in range(TEXT_LAYERS)],
        norm=jnp.ones((1, TEXT_HIDDEN)),
    )
    return dict(
        audio=audio,
        proj_w=nrm((AUDIO_D, TEXT_HIDDEN)),
        proj_b=nrm((TEXT_HIDDEN,)).reshape(1, TEXT_HIDDEN),
        text=text,
    )


# ----------------------------- model forward ---------------------------------
def get_audio_feature(params, input_features, audio_feature_len):
    """input_features: (num_mel_bins, T) — torch NCW without the batch dim."""
    p = params["audio"]
    x = input_features.T                                            # (T, mel)
    x = conv_gelu(im2col_1d(x, 3, 1, 1), p["conv1_w"], p["conv1_b"])
    x = conv_gelu(im2col_1d(x, 3, 2, 1), p["conv2_w"], p["conv2_b"])
    L = x.shape[0]
    x = x + p["embed_positions"][:L]
    for lp in p["layers"]:
        x = audio_layer(x, lp)                 # one fused kernel per layer
    # avgpool(2) + final LN + multi_modal_projector, fused
    audio_embeds = pool_ln_proj(x, p["ln_post_g"], p["ln_post_b"],
                                params["proj_w"], params["proj_b"])
    return audio_embeds[:audio_feature_len]


def language_model_forward(p, inputs_embeds, positions):
    cos_f, sin_f = rope_cos_sin(positions, TEXT_HEAD_DIM)
    x = inputs_embeds
    for lp in p["layers"]:
        x = text_layer(x, cos_f, sin_f, lp)    # one fused kernel per layer
    hidden, logits = final_norm_head(x, p["norm"], p["lm_head"])
    return hidden, logits


@partial(jax.jit, static_argnames=("audio_feature_len",))
def forward(params, input_ids, positions, input_features, audio_feature_len):
    # get_audio_feature + general_mm_embed_routine merge + language model.
    audio_embeds = get_audio_feature(params, input_features, audio_feature_len)
    tok_embeds = jnp.take(params["text"]["embed_tokens"], input_ids, axis=0)
    is_audio = input_ids == AUDIO_TOKEN_ID
    slot = jnp.clip(jnp.cumsum(is_audio.astype(jnp.int32)) - 1,
                    0, audio_feature_len - 1)
    merged = jnp.where(is_audio[:, None], audio_embeds[slot], tok_embeds)
    hidden, logits = language_model_forward(params["text"], merged, positions)
    return hidden, logits
    # TODO(synk): ForwardBatch / radix-cache / paged-KV plumbing and the
    # weight-loading remapping have no Pallas equivalent; omitted.


# ----------------------------- main ------------------------------------------
if __name__ == "__main__":
    key = jax.random.PRNGKey(0)
    pkey, fkey = jax.random.split(key)
    params = init_params(pkey)

    input_features = jax.random.normal(fkey, (NUM_MEL, T_MEL), jnp.float32)
    input_ids = jnp.array(
        [1, 2, AUDIO_TOKEN_ID, AUDIO_TOKEN_ID, AUDIO_TOKEN_ID, AUDIO_TOKEN_ID, 3, 4],
        jnp.int32)
    positions = jnp.arange(SEQ, dtype=jnp.int32)
    audio_feature_len = 4   # item.audio_feature_lens

    hidden, logits = forward(params, input_ids, positions,
                             input_features, audio_feature_len)
    jax.block_until_ready((hidden, logits))

    assert hidden.shape == (SEQ, TEXT_HIDDEN)
    assert logits.shape == (SEQ, VOCAB)
    assert bool(jnp.all(jnp.isfinite(hidden))) and bool(jnp.all(jnp.isfinite(logits)))
    print("KERNEL_OK")
</pallas_src>

<mosaic_0001>
module attributes {stable_mosaic.version = 11 : i64} {
  func.func @_conv_gelu_kernel(%arg0: memref<32x24xf32, #tpu.memory_space<vmem>>, %arg1: memref<24x32xf32, #tpu.memory_space<vmem>>, %arg2: memref<1x32xf32, #tpu.memory_space<vmem>>, %arg3: memref<32x32xf32, #tpu.memory_space<vmem>>) attributes {dimension_semantics = [], scalar_prefetch = 0 : i64, scratch_operands = 0 : i64, tpu.core_type = #tpu.core_type<tc>} {
    %c0 = arith.constant 0 : index
    %c0_0 = arith.constant 0 : index
    %0 = vector.load %arg0[%c0, %c0_0] : memref<32x24xf32, #tpu.memory_space<vmem>>, vector<32x24xf32>
    %c0_1 = arith.constant 0 : index
    %c0_2 = arith.constant 0 : index
    %1 = vector.load %arg1[%c0_1, %c0_2] : memref<24x32xf32, #tpu.memory_space<vmem>>, vector<24x32xf32>
    %cst = arith.constant dense<0.000000e+00> : vector<32x32xf32>
    %2 = tpu.matmul %0, %1, %cst {dimension_numbers = #tpu.dot_dimension_numbers<[1], [0], [0], [1], [0, 0, 1, 1], [], []>} : vector<32x24xf32>, vector<24x32xf32>, vector<32x32xf32> -> vector<32x32xf32>
    %c0_3 = arith.constant 0 : index
    %c0_4 = arith.constant 0 : index
    %3 = vector.load %arg2[%c0_3, %c0_4] : memref<1x32xf32, #tpu.memory_space<vmem>>, vector<1x32xf32>
    %4 = vector.broadcast %3 : vector<1x32xf32> to vector<32x32xf32>
    %5 = arith.addf %2, %4 : vector<32x32xf32>
    %6 = arith.mulf %5, %5 : vector<32x32xf32>
    %7 = arith.mulf %5, %6 : vector<32x32xf32>
    %cst_5 = arith.constant 4.471500e-02 : f32
    %8 = vector.broadcast %cst_5 : f32 to vector<32x32xf32>
    %9 = arith.mulf %8, %7 : vector<32x32xf32>
    %10 = arith.addf %5, %9 : vector<32x32xf32>
    %cst_6 = arith.constant 0.797884583 : f32
    %11 = vector.broadcast %cst_6 : f32 to vector<32x32xf32>
    %12 = arith.mulf %11, %10 : vector<32x32xf32>
    %13 = math.tanh %12 : vector<32x32xf32>
    %cst_7 = arith.constant 1.000000e+00 : f32
    %14 = vector.broadcast %cst_7 : f32 to vector<32x32xf32>
    %15 = arith.addf %14, %13 : vector<32x32xf32>
    %cst_8 = arith.constant 5.000000e-01 : f32
    %16 = vector.broadcast %cst_8 : f32 to vector<32x32xf32>
    %17 = arith.mulf %16, %15 : vector<32x32xf32>
    %18 = arith.mulf %5, %17 : vector<32x32xf32>
    %c0_9 = arith.constant 0 : index
    %c0_10 = arith.constant 0 : index
    %19 = vector.load %arg3[%c0_9, %c0_10] : memref<32x32xf32, #tpu.memory_space<vmem>>, vector<32x32xf32>
    tpu.vector_store %arg3[%c0_9, %c0_10], %18 {strides = array<i32>} : memref<32x32xf32, #tpu.memory_space<vmem>>, vector<32x32xf32>,
    return
  }
}

module attributes {stable_mosaic.version = 11 : i64} {
  func.func @_conv_gelu_kernel(%arg0: memref<16x96xf32, #tpu.memory_space<vmem>>, %arg1: memref<96x32xf32, #tpu.memory_space<vmem>>, %arg2: memref<1x32xf32, #tpu.memory_space<vmem>>, %arg3: memref<16x32xf32, #tpu.memory_space<vmem>>) attributes {dimension_semantics = [], scalar_prefetch = 0 : i64, scratch_operands = 0 : i64, tpu.core_type = #tpu.core_type<tc>} {
    %c0 = arith.constant 0 : index
    %c0_0 = arith.constant 0 : index
    %0 = vector.load %arg0[%c0, %c0_0] : memref<16x96xf32, #tpu.memory_space<vmem>>, vector<16x96xf32>
    %c0_1 = arith.constant 0 : index
    %c0_2 = arith.constant 0 : index
    %1 = vector.load %arg1[%c0_1, %c0_2] : memref<96x32xf32, #tpu.memory_space<vmem>>, vector<96x32xf32>
    %cst = arith.constant dense<0.000000e+00> : vector<16x32xf32>
    %2 = tpu.matmul %0, %1, %cst {dimension_numbers = #tpu.dot_dimension_numbers<[1], [0], [0], [1], [0, 0, 1, 1], [], []>} : vector<16x96xf32>, vector<96x32xf32>, vector<16x32xf32> -> vector<16x32xf32>
    %c0_3 = arith.constant 0 : index
    %c0_4 = arith.constant 0 : index
    %3 = vector.load %arg2[%c0_3, %c0_4] : memref<1x32xf32, #tpu.memory_space<vmem>>, vector<1x32xf32>
    %4 = vector.broadcast %3 : vector<1x32xf32> to vector<16x32xf32>
    %5 = arith.addf %2, %4 : vector<16x32xf32>
    %6 = arith.mulf %5, %5 : vector<16x32xf32>
    %7 = arith.mulf %5, %6 : vector<16x32xf32>
    %cst_5 = arith.constant 4.471500e-02 : f32
    %8 = vector.broadcast %cst_5 : f32 to vector<16x32xf32>
    %9 = arith.mulf %8, %7 : vector<16x32xf32>
    %10 = arith.addf %5, %9 : vector<16x32xf32>
    %cst_6 = arith.constant 0.797884583 : f32
    %11 = vector.broadcast %cst_6 : f32 to vector<16x32xf32>
    %12 = arith.mulf %11, %10 : vector<16x32xf32>
    %13 = math.tanh %12 : vector<16x32xf32>
    %cst_7 = arith.constant 1.000000e+00 : f32
    %14 = vector.broadcast %cst_7 : f32 to vector<16x32xf32>
    %15 = arith.addf %14, %13 : vector<16x32xf32>
    %cst_8 = arith.constant 5.000000e-01 : f32
    %16 = vector.broadcast %cst_8 : f32 to vector<16x32xf32>
    %17 = arith.mulf %16, %15 : vector<16x32xf32>
    %18 = arith.mulf %5, %17 : vector<16x32xf32>
    %c0_9 = arith.constant 0 : index
    %c0_10 = arith.constant 0 : index
    %19 = vector.load %arg3[%c0_9, %c0_10] : memref<16x32xf32, #tpu.memory_space<vmem>>, vector<16x32xf32>
    tpu.vector_store %arg3[%c0_9, %c0_10], %18 {strides = array<i32>} : memref<16x32xf32, #tpu.memory_space<vmem>>, vector<16x32xf32>,
    return
  }
}

module attributes {stable_mosaic.version = 11 : i64} {
  func.func @_pool_ln_proj_kernel(%arg0: memref<8x32xf32, #tpu.memory_space<vmem>>, %arg1: memref<8x32xf32, #tpu.memory_space<vmem>>, %arg2: memref<1x32xf32, #tpu.memory_space<vmem>>, %arg3: memref<1x32xf32, #tpu.memory_space<vmem>>, %arg4: memref<32x32xf32, #tpu.memory_space<vmem>>, %arg5: memref<1x32xf32, #tpu.memory_space<vmem>>, %arg6: memref<8x32xf32, #tpu.memory_space<vmem>>) attributes {dimension_semantics = [], scalar_prefetch = 0 : i64, scratch_operands = 0 : i64, tpu.core_type = #tpu.core_type<tc>} {
    %c0 = arith.constant 0 : index
    %c0_0 = arith.constant 0 : index
    %0 = vector.load %arg0[%c0, %c0_0] : memref<8x32xf32, #tpu.memory_space<vmem>>, vector<8x32xf32>
    %c0_1 = arith.constant 0 : index
    %c0_2 = arith.constant 0 : index
    %1 = vector.load %arg1[%c0_1, %c0_2] : memref<8x32xf32, #tpu.memory_space<vmem>>, vector<8x32xf32>
    %2 = arith.addf %0, %1 : vector<8x32xf32>
    %cst = arith.constant 5.000000e-01 : f32
    %3 = vector.broadcast %cst : f32 to vector<8x32xf32>
    %4 = arith.mulf %3, %2 : vector<8x32xf32>
    %c0_3 = arith.constant 0 : index
    %c0_4 = arith.constant 0 : index
    %5 = vector.load %arg2[%c0_3, %c0_4] : memref<1x32xf32, #tpu.memory_space<vmem>>, vector<1x32xf32>
    %c0_5 = arith.constant 0 : index
    %c0_6 = arith.constant 0 : index
    %6 = vector.load %arg3[%c0_5, %c0_6] : memref<1x32xf32, #tpu.memory_space<vmem>>, vector<1x32xf32>
    %cst_7 = arith.constant dense<0.000000e+00> : vector<8xf32>
    %7 = vector.multi_reduction <add>, %4, %cst_7 [1] : vector<8x32xf32> to vector<8xf32>
    %8 = vector.shape_cast %7 : vector<8xf32> to vector<8x1xf32>
    %cst_8 = arith.constant 3.200000e+01 : f32
    %9 = vector.broadcast %cst_8 : f32 to vector<8x1xf32>
    %10 = arith.divf %8, %9 : vector<8x1xf32>
    %11 = vector.broadcast %10 : vector<8x1xf32> to vector<8x32xf32>
    %12 = arith.subf %4, %11 : vector<8x32xf32>
    %13 = arith.mulf %12, %12 : vector<8x32xf32>
    %cst_9 = arith.constant dense<0.000000e+00> : vector<8xf32>
    %14 = vector.multi_reduction <add>, %13, %cst_9 [1] : vector<8x32xf32> to vector<8xf32>
    %15 = vector.shape_cast %14 : vector<8xf32> to vector<8x1xf32>
    %cst_10 = arith.constant 3.200000e+01 : f32
    %16 = vector.broadcast %cst_10 : f32 to vector<8x1xf32>
    %17 = arith.divf %15, %16 : vector<8x1xf32>
    %18 = vector.broadcast %10 : vector<8x1xf32> to vector<8x32xf32>
    %19 = arith.subf %4, %18 : vector<8x32xf32>
    %cst_11 = arith.constant 9.99999974E-6 : f32
    %20 = vector.broadcast %cst_11 : f32 to vector<8x1xf32>
    %21 = arith.addf %17, %20 : vector<8x1xf32>
    %22 = math.rsqrt %21 : vector<8x1xf32>
    %23 = vector.broadcast %22 : vector<8x1xf32> to vector<8x32xf32>
    %24 = arith.mulf %19, %23 : vector<8x32xf32>
    %25 = vector.broadcast %5 : vector<1x32xf32> to vector<8x32xf32>
    %26 = arith.mulf %24, %25 : vector<8x32xf32>
    %27 = vector.broadcast %6 : vector<1x32xf32> to vector<8x32xf32>
    %28 = arith.addf %26, %27 : vector<8x32xf32>
    %c0_12 = arith.constant 0 : index
    %c0_13 = arith.constant 0 : index
    %29 = vector.load %arg4[%c0_12, %c0_13] : memref<32x32xf32, #tpu.memory_space<vmem>>, vector<32x32xf32>
    %cst_14 = arith.constant dense<0.000000e+00> : vector<8x32xf32>
    %30 = tpu.matmul %28, %29, %cst_14 {dimension_numbers = #tpu.dot_dimension_numbers<[1], [0], [0], [1], [0, 0, 1, 1], [], []>} : vector<8x32xf32>, vector<32x32xf32>, vector<8x32xf32> -> vector<8x32xf32>
    %c0_15 = arith.constant 0 : index
    %c0_16 = arith.constant 0 : index
    %31 = vector.load %arg5[%c0_15, %c0_16] : memref<1x32xf32, #tpu.memory_space<vmem>>, vector<1x32xf32>
    %32 = vector.broadcast %31 : vector<1x32xf32> to vector<8x32xf32>
    %33 = arith.addf %30, %32 : vector<8x32xf32>
    %c0_17 = arith.constant 0 : index
    %c0_18 = arith.constant 0 : index
    %34 = vector.load %arg6[%c0_17, %c0_18] : memref<8x32xf32, #tpu.memory_space<vmem>>, vector<8x32xf32>
    tpu.vector_store %arg6[%c0_17, %c0_18], %33 {strides = array<i32>} : memref<8x32xf32, #tpu.memory_space<vmem>>, vector<8x32xf32>,
    return
  }
}

module attributes {stable_mosaic.version = 11 : i64} {
  func.func @_audio_layer_kernel(%arg0: memref<16x32xf32, #tpu.memory_space<vmem>>, %arg1: memref<1x32xf32, #tpu.memory_space<vmem>>, %arg2: memref<1x32xf32, #tpu.memory_space<vmem>>, %arg3: memref<32x96xf32, #tpu.memory_space<vmem>>, %arg4: memref<1x96xf32, #tpu.memory_space<vmem>>, %arg5: memref<32x32xf32, #tpu.memory_space<vmem>>, %arg6: memref<1x32xf32, #tpu.memory_space<vmem>>, %arg7: memref<1x32xf32, #tpu.memory_space<vmem>>, %arg8: memref<1x32xf32, #tpu.memory_space<vmem>>, %arg9: memref<32x64xf32, #tpu.memory_space<vmem>>, %arg10: memref<1x64xf32, #tpu.memory_space<vmem>>, %arg11: memref<64x32xf32, #tpu.memory_space<vmem>>, %arg12: memref<1x32xf32, #tpu.memory_space<vmem>>, %arg13: memref<16x32xf32, #tpu.memory_space<vmem>>) attributes {dimension_semantics = [], scalar_prefetch = 0 : i64, scratch_operands = 0 : i64, tpu.core_type = #tpu.core_type<tc>} {
    %c0 = arith.constant 0 : index
    %c0_0 = arith.constant 0 : index
    %0 = vector.load %arg0[%c0, %c0_0] : memref<16x32xf32, #tpu.memory_space<vmem>>, vector<16x32xf32>
    %c0_1 = arith.constant 0 : index
    %c0_2 = arith.constant 0 : index
    %1 = vector.load %arg1[%c0_1, %c0_2] : memref<1x32xf32, #tpu.memory_space<vmem>>, vector<1x32xf32>
    %c0_3 = arith.constant 0 : index
    %c0_4 = arith.constant 0 : index
    %2 = vector.load %arg2[%c0_3, %c0_4] : memref<1x32xf32, #tpu.memory_space<vmem>>, vector<1x32xf32>
    %cst = arith.constant dense<0.000000e+00> : vector<16xf32>
    %3 = vector.multi_reduction <add>, %0, %cst [1] : vector<16x32xf32> to vector<16xf32>
    %4 = vector.shape_cast %3 : vector<16xf32> to vector<16x1xf32>
    %cst_5 = arith.constant 3.200000e+01 : f32
    %5 = vector.broadcast %cst_5 : f32 to vector<16x1xf32>
    %6 = arith.divf %4, %5 : vector<16x1xf32>
    %7 = vector.broadcast %6 : vector<16x1xf32> to vector<16x32xf32>
    %8 = arith.subf %0, %7 : vector<16x32xf32>
    %9 = arith.mulf %8, %8 : vector<16x32xf32>
    %cst_6 = arith.constant dense<0.000000e+00> : vector<16xf32>
    %10 = vector.multi_reduction <add>, %9, %cst_6 [1] : vector<16x32xf32> to vector<16xf32>
    %11 = vector.shape_cast %10 : vector<16xf32> to vector<16x1xf32>
    %cst_7 = arith.constant 3.200000e+01 : f32
    %12 = vector.broadcast %cst_7 : f32 to vector<16x1xf32>
    %13 = arith.divf %11, %12 : vector<16x1xf32>
    %14 = vector.broadcast %6 : vector<16x1xf32> to vector<16x32xf32>
    %15 = arith.subf %0, %14 : vector<16x32xf32>
    %cst_8 = arith.constant 9.99999974E-6 : f32
    %16 = vector.broadcast %cst_8 : f32 to vector<16x1xf32>
    %17 = arith.addf %13, %16 : vector<16x1xf32>
    %18 = math.rsqrt %17 : vector<16x1xf32>
    %19 = vector.broadcast %18 : vector<16x1xf32> to vector<16x32xf32>
    %20 = arith.mulf %15, %19 : vector<16x32xf32>
    %21 = vector.broadcast %1 : vector<1x32xf32> to vector<16x32xf32>
    %22 = arith.mulf %20, %21 : vector<16x32xf32>
    %23 = vector.broadcast %2 : vector<1x32xf32> to vector<16x32xf32>
    %24 = arith.addf %22, %23 : vector<16x32xf32>
    %c0_9 = arith.constant 0 : index
    %c0_10 = arith.constant 0 : index
    %25 = vector.load %arg3[%c0_9, %c0_10] : memref<32x96xf32, #tpu.memory_space<vmem>>, vector<32x96xf32>
    %cst_11 = arith.constant dense<0.000000e+00> : vector<16x96xf32>
    %26 = tpu.matmul %24, %25, %cst_11 {dimension_numbers = #tpu.dot_dimension_numbers<[1], [0], [0], [1], [0, 0, 1, 1], [], []>} : vector<16x32xf32>, vector<32x96xf32>, vector<16x96xf32> -> vector<16x96xf32>
    %c0_12 = arith.constant 0 : index
    %c0_13 = arith.constant 0 : index
    %27 = vector.load %arg4[%c0_12, %c0_13] : memref<1x96xf32, #tpu.memory_space<vmem>>, vector<1x96xf32>
    %28 = vector.broadcast %27 : vector<1x96xf32> to vector<16x96xf32>
    %29 = arith.addf %26, %28 : vector<16x96xf32>
    %30 = vector.extract_strided_slice %29 {offsets = [0, 0], sizes = [16, 32], strides = [1, 1]} : vector<16x96xf32> to vector<16x32xf32>
    %cst_14 = arith.constant 0.353553385 : f32
    %31 = vector.broadcast %cst_14 : f32 to vector<16x32xf32>
    %32 = arith.mulf %30, %31 : vector<16x32xf32>
    %33 = vector.extract_strided_slice %29 {offsets = [0, 32], sizes = [16, 32], strides = [1, 1]} : vector<16x96xf32> to vector<16x32xf32>
    %34 = vector.extract_strided_slice %29 {offsets = [0, 64], sizes = [16, 32], strides = [1, 1]} : vector<16x96xf32> to vector<16x32xf32>
    %35 = vector.extract_strided_slice %32 {offsets = [0, 0], sizes = [16, 8], strides = [1, 1]} : vector<16x32xf32> to vector<16x8xf32>
    %36 = vector.extract_strided_slice %33 {offsets = [0, 0], sizes = [16, 8], strides = [1, 1]} : vector<16x32xf32> to vector<16x8xf32>
    %cst_15 = arith.constant dense<0.000000e+00> : vector<16x16xf32>
    %37 = tpu.matmul %35, %36, %cst_15 {dimension_numbers = #tpu.dot_dimension_numbers<[1], [1], [0], [0], [0, 0, 1, 0], [], []>} : vector<16x8xf32>, vector<16x8xf32>, vector<16x16xf32> -> vector<16x16xf32>
    %cst_16 = arith.constant dense<0xFF800000> : vector<16xf32>
    %38 = vector.multi_reduction <maximumf>, %37, %cst_16 [1] : vector<16x16xf32> to vector<16xf32>
    %39 = vector.shape_cast %38 : vector<16xf32> to vector<16x1xf32>
    %40 = vector.broadcast %39 : vector<16x1xf32> to vector<16x16xf32>
    %41 = arith.subf %37, %40 : vector<16x16xf32>
    %42 = math.exp %41 : vector<16x16xf32>
    %cst_17 = arith.constant dense<0.000000e+00> : vector<16xf32>
    %43 = vector.multi_reduction <add>, %42, %cst_17 [1] : vector<16x16xf32> to vector<16xf32>
    %44 = vector.shape_cast %43 : vector<16xf32> to vector<16x1xf32>
    %45 = tpu.reciprocal %44 {approx = true} : vector<16x1xf32> -> vector<16x1xf32>
    %46 = vector.broadcast %45 : vector<16x1xf32> to vector<16x16xf32>
    %47 = arith.mulf %42, %46 : vector<16x16xf32>
    %48 = vector.extract_strided_slice %34 {offsets = [0, 0], sizes = [16, 8], strides = [1, 1]} : vector<16x32xf32> to vector<16x8xf32>
    %cst_18 = arith.constant dense<0.000000e+00> : vector<16x8xf32>
    %49 = tpu.matmul %47, %48, %cst_18 {dimension_numbers = #tpu.dot_dimension_numbers<[1], [0], [0], [1], [0, 0, 1, 1], [], []>} : vector<16x16xf32>, vector<16x8xf32>, vector<16x8xf32> -> vector<16x8xf32>
    %50 = vector.extract_strided_slice %32 {offsets = [0, 8], sizes = [16, 8], strides = [1, 1]} : vector<16x32xf32> to vector<16x8xf32>
    %51 = vector.extract_strided_slice %33 {offsets = [0, 8], sizes = [16, 8], strides = [1, 1]} : vector<16x32xf32> to vector<16x8xf32>
    %cst_19 = arith.constant dense<0.000000e+00> : vector<16x16xf32>
    %52 = tpu.matmul %50, %51, %cst_19 {dimension_numbers = #tpu.dot_dimension_numbers<[1], [1], [0], [0], [0, 0, 1, 0], [], []>} : vector<16x8xf32>, vector<16x8xf32>, vector<16x16xf32> -> vector<16x16xf32>
    %cst_20 = arith.constant dense<0xFF800000> : vector<16xf32>
    %53 = vector.multi_reduction <maximumf>, %52, %cst_20 [1] : vector<16x16xf32> to vector<16xf32>
    %54 = vector.shape_cast %53 : vector<16xf32> to vector<16x1xf32>
    %55 = vector.broadcast %54 : vector<16x1xf32> to vector<16x16xf32>
    %56 = arith.subf %52, %55 : vector<16x16xf32>
    %57 = math.exp %56 : vector<16x16xf32>
    %cst_21 = arith.constant dense<0.000000e+00> : vector<16xf32>
    %58 = vector.multi_reduction <add>, %57, %cst_21 [1] : vector<16x16xf32> to vector<16xf32>
    %59 = vector.shape_cast %58 : vector<16xf32> to vector<16x1xf32>
    %60 = tpu.reciprocal %59 {approx = true} : vector<16x1xf32> -> vector<16x1xf32>
    %61 = vector.broadcast %60 : vector<16x1xf32> to vector<16x16xf32>
    %62 = arith.mulf %57, %61 : vector<16x16xf32>
    %63 = vector.extract_strided_slice %34 {offsets = [0, 8], sizes = [16, 8], strides = [1, 1]} : vector<16x32xf32> to vector<16x8xf32>
    %cst_22 = arith.constant dense<0.000000e+00> : vector<16x8xf32>
    %64 = tpu.matmul %62, %63, %cst_22 {dimension_numbers = #tpu.dot_dimension_numbers<[1], [0], [0], [1], [0, 0, 1, 1], [], []>} : vector<16x16xf32>, vector<16x8xf32>, vector<16x8xf32> -> vector<16x8xf32>
    %65 = vector.extract_strided_slice %32 {offsets = [0, 16], sizes = [16, 8], strides = [1, 1]} : vector<16x32xf32> to vector<16x8xf32>
    %66 = vector.extract_strided_slice %33 {offsets = [0, 16], sizes = [16, 8], strides = [1, 1]} : vector<16x32xf32> to vector<16x8xf32>
    %cst_23 = arith.constant dense<0.000000e+00> : vector<16x16xf32>
    %67 = tpu.matmul %65, %66, %cst_23 {dimension_numbers = #tpu.dot_dimension_numbers<[1], [1], [0], [0], [0, 0, 1, 0], [], []>} : vector<16x8xf32>, vector<16x8xf32>, vector<16x16xf32> -> vector<16x16xf32>
    %cst_24 = arith.constant dense<0xFF800000> : vector<16xf32>
    %68 = vector.multi_reduction <maximumf>, %67, %cst_24 [1] : vector<16x16xf32> to vector<16xf32>
    %69 = vector.shape_cast %68 : vector<16xf32> to vector<16x1xf32>
    %70 = vector.broadcast %69 : vector<16x1xf32> to vector<16x16xf32>
    %71 = arith.subf %67, %70 : vector<16x16xf32>
    %72 = math.exp %71 : vector<16x16xf32>
    %cst_25 = arith.constant dense<0.000000e+00> : vector<16xf32>
    %73 = vector.multi_reduction <add>, %72, %cst_25 [1] : vector<16x16xf32> to vector<16xf32>
    %74 = vector.shape_cast %73 : vector<16xf32> to vector<16x1xf32>
    %75 = tpu.reciprocal %74 {approx = true} : vector<16x1xf32> -> vector<16x1xf32>
    %76 = vector.broadcast %75 : vector<16x1xf32> to vector<16x16xf32>
    %77 = arith.mulf %72, %76 : vector<16x16xf32>
    %78 = vector.extract_strided_slice %34 {offsets = [0, 16], sizes = [16, 8], strides = [1, 1]} : vector<16x32xf32> to vector<16x8xf32>
    %cst_26 = arith.constant dense<0.000000e+00> : vector<16x8xf32>
    %79 = tpu.matmul %77, %78, %cst_26 {dimension_numbers = #tpu.dot_dimension_numbers<[1], [0], [0], [1], [0, 0, 1, 1], [], []>} : vector<16x16xf32>, vector<16x8xf32>, vector<16x8xf32> -> vector<16x8xf32>
    %80 = vector.extract_strided_slice %32 {offsets = [0, 24], sizes = [16, 8], strides = [1, 1]} : vector<16x32xf32> to vector<16x8xf32>
    %81 = vector.extract_strided_slice %33 {offsets = [0, 24], sizes = [16, 8], strides = [1, 1]} : vector<16x32xf32> to vector<16x8xf32>
    %cst_27 = arith.constant dense<0.000000e+00> : vector<16x16xf32>
    %82 = tpu.matmul %80, %81, %cst_27 {dimension_numbers = #tpu.dot_dimension_numbers<[1], [1], [0], [0], [0, 0, 1, 0], [], []>} : vector<16x8xf32>, vector<16x8xf32>, vector<16x16xf32> -> vector<16x16xf32>
    %cst_28 = arith.constant dense<0xFF800000> : vector<16xf32>
    %83 = vector.multi_reduction <maximumf>, %82, %cst_28 [1] : vector<16x16xf32> to vector<16xf32>
    %84 = vector.shape_cast %83 : vector<16xf32> to vector<16x1xf32>
    %85 = vector.broadcast %84 : vector<16x1xf32> to vector<16x16xf32>
    %86 = arith.subf %82, %85 : vector<16x16xf32>
    %87 = math.exp %86 : vector<16x16xf32>
    %cst_29 = arith.constant dense<0.000000e+00> : vector<16xf32>
    %88 = vector.multi_reduction <add>, %87, %cst_29 [1] : vector<16x16xf32> to vector<16xf32>
    %89 = vector.shape_cast %88 : vector<16xf32> to vector<16x1xf32>
    %90 = tpu.reciprocal %89 {approx = true} : vector<16x1xf32> -> vector<16x1xf32>
    %91 = vector.broadcast %90 : vector<16x1xf32> to vector<16x16xf32>
    %92 = arith.mulf %87, %91 : vector<16x16xf32>
    %93 = vector.extract_strided_slice %34 {offsets = [0, 24], sizes = [16, 8], strides = [1, 1]} : vector<16x32xf32> to vector<16x8xf32>
    %cst_30 = arith.constant dense<0.000000e+00> : vector<16x8xf32>
    %94 = tpu.matmul %92, %93, %cst_30 {dimension_numbers = #tpu.dot_dimension_numbers<[1], [0], [0], [1], [0, 0, 1, 1], [], []>} : vector<16x16xf32>, vector<16x8xf32>, vector<16x8xf32> -> vector<16x8xf32>
    %95 = tpu.concatenate %49, %64, %79, %94 in 1 : vector<16x8xf32>, vector<16x8xf32>, vector<16x8xf32>, vector<16x8xf32> -> vector<16x32xf32>
    %c0_31 = arith.constant 0 : index
    %c0_32 = arith.constant 0 : index
    %96 = vector.load %arg5[%c0_31, %c0_32] : memref<32x32xf32, #tpu.memory_space<vmem>>, vector<32x32xf32>
    %cst_33 = arith.constant dense<0.000000e+00> : vector<16x32xf32>
    %97 = tpu.matmul %95, %96, %cst_33 {dimension_numbers = #tpu.dot_dimension_numbers<[1], [0], [0], [1], [0, 0, 1, 1], [], []>} : vector<16x32xf32>, vector<32x32xf32>, vector<16x32xf32> -> vector<16x32xf32>
    %98 = arith.addf %0, %97 : vector<16x32xf32>
    %c0_34 = arith.constant 0 : index
    %c0_35 = arith.constant 0 : index
    %99 = vector.load %arg6[%c0_34, %c0_35] : memref<1x32xf32, #tpu.memory_space<vmem>>, vector<1x32xf32>
    %100 = vector.broadcast %99 : vector<1x32xf32> to vector<16x32xf32>
    %101 = arith.addf %98, %100 : vector<16x32xf32>
    %c0_36 = arith.constant 0 : index
    %c0_37 = arith.constant 0 : index
    %102 = vector.load %arg7[%c0_36, %c0_37] : memref<1x32xf32, #tpu.memory_space<vmem>>, vector<1x32xf32>
    %c0_38 = arith.constant 0 : index
    %c0_39 = arith.constant 0 : index
    %103 = vector.load %arg8[%c0_38, %c0_39] : memref<1x32xf32, #tpu.memory_space<vmem>>, vector<1x32xf32>
    %cst_40 = arith.constant dense<0.000000e+00> : vector<16xf32>
    %104 = vector.multi_reduction <add>, %101, %cst_40 [1] : vector<16x32xf32> to vector<16xf32>
    %105 = vector.shape_cast %104 : vector<16xf32> to vector<16x1xf32>
    %cst_41 = arith.constant 3.200000e+01 : f32
    %106 = vector.broadcast %cst_41 : f32 to vector<16x1xf32>
    %107 = arith.divf %105, %106 : vector<16x1xf32>
    %108 = vector.broadcast %107 : vector<16x1xf32> to vector<16x32xf32>
    %109 = arith.subf %101, %108 : vector<16x32xf32>
    %110 = arith.mulf %109, %109 : vector<16x32xf32>
    %cst_42 = arith.constant dense<0.000000e+00> : vector<16xf32>
    %111 = vector.multi_reduction <add>, %110, %cst_42 [1] : vector<16x32xf32> to vector<16xf32>
    %112 = vector.shape_cast %111 : vector<16xf32> to vector<16x1xf32>
    %cst_43 = arith.constant 3.200000e+01 : f32
    %113 = vector.broadcast %cst_43 : f32 to vector<16x1xf32>
    %114 = arith.divf %112, %113 : vector<16x1xf32>
    %115 = vector.broadcast %107 : vector<16x1xf32> to vector<16x32xf32>
    %116 = arith.subf %101, %115 : vector<16x32xf32>
    %cst_44 = arith.constant 9.99999974E-6 : f32
    %117 = vector.broadcast %cst_44 : f32 to vector<16x1xf32>
    %118 = arith.addf %114, %117 : vector<16x1xf32>
    %119 = math.rsqrt %118 : vector<16x1xf32>
    %120 = vector.broadcast %119 : vector<16x1xf32> to vector<16x32xf32>
    %121 = arith.mulf %116, %120 : vector<16x32xf32>
    %122 = vector.broadcast %102 : vector<1x32xf32> to vector<16x32xf32>
    %123 = arith.mulf %121, %122 : vector<16x32xf32>
    %124 = vector.broadcast %103 : vector<1x32xf32> to vector<16x32xf32>
    %125 = arith.addf %123, %124 : vector<16x32xf32>
    %c0_45 = arith.constant 0 : index
    %c0_46 = arith.constant 0 : index
    %126 = vector.load %arg9[%c0_45, %c0_46] : memref<32x64xf32, #tpu.memory_space<vmem>>, vector<32x64xf32>
    %cst_47 = arith.constant dense<0.000000e+00> : vector<16x64xf32>
    %127 = tpu.matmul %125, %126, %cst_47 {dimension_numbers = #tpu.dot_dimension_numbers<[1], [0], [0], [1], [0, 0, 1, 1], [], []>} : vector<16x32xf32>, vector<32x64xf32>, vector<16x64xf32> -> vector<16x64xf32>
    %c0_48 = arith.constant 0 : index
    %c0_49 = arith.constant 0 : index
    %128 = vector.load %arg10[%c0_48, %c0_49] : memref<1x64xf32, #tpu.memory_space<vmem>>, vector<1x64xf32>
    %129 = vector.broadcast %128 : vector<1x64xf32> to vector<16x64xf32>
    %130 = arith.addf %127, %129 : vector<16x64xf32>
    %131 = arith.mulf %130, %130 : vector<16x64xf32>
    %132 = arith.mulf %130, %131 : vector<16x64xf32>
    %cst_50 = arith.constant 4.471500e-02 : f32
    %133 = vector.broadcast %cst_50 : f32 to vector<16x64xf32>
    %134 = arith.mulf %133, %132 : vector<16x64xf32>
    %135 = arith.addf %130, %134 : vector<16x64xf32>
    %cst_51 = arith.constant 0.797884583 : f32
    %136 = vector.broadcast %cst_51 : f32 to vector<16x64xf32>
    %137 = arith.mulf %136, %135 : vector<16x64xf32>
    %138 = math.tanh %137 : vector<16x64xf32>
    %cst_52 = arith.constant 1.000000e+00 : f32
    %139 = vector.broadcast %cst_52 : f32 to vector<16x64xf32>
    %140 = arith.addf %139, %138 : vector<16x64xf32>
    %cst_53 = arith.constant 5.000000e-01 : f32
    %141 = vector.broadcast %cst_53 : f32 to vector<16x64xf32>
    %142 = arith.mulf %141, %140 : vector<16x64xf32>
    %143 = arith.mulf %130, %142 : vector<16x64xf32>
    %c0_54 = arith.constant 0 : index
    %c0_55 = arith.constant 0 : index
    %144 = vector.load %arg11[%c0_54, %c0_55] : memref<64x32xf32, #tpu.memory_space<vmem>>, vector<64x32xf32>
    %cst_56 = arith.constant dense<0.000000e+00> : vector<16x32xf32>
    %145 = tpu.matmul %143, %144, %cst_56 {dimension_numbers = #tpu.dot_dimension_numbers<[1], [0], [0], [1], [0, 0, 1, 1], [], []>} : vector<16x64xf32>, vector<64x32xf32>, vector<16x32xf32> -> vector<16x32xf32>
    %146 = arith.addf %101, %145 : vector<16x32xf32>
    %c0_57 = arith.constant 0 : index
    %c0_58 = arith.constant 0 : index
    %147 = vector.load %arg12[%c0_57, %c0_58] : memref<1x32xf32, #tpu.memory_space<vmem>>, vector<1x32xf32>
    %148 = vector.broadcast %147 : vector<1x32xf32> to vector<16x32xf32>
    %149 = arith.addf %146, %148 : vector<16x32xf32>
    %c0_59 = arith.constant 0 : index
    %c0_60 = arith.constant 0 : index
    %150 = vector.load %arg13[%c0_59, %c0_60] : memref<16x32xf32, #tpu.memory_space<vmem>>, vector<16x32xf32>
    tpu.vector_store %arg13[%c0_59, %c0_60], %149 {strides = array<i32>} : memref<16x32xf32, #tpu.memory_space<vmem>>, vector<16x32xf32>,
    return
  }
}

module attributes {stable_mosaic.version = 11 : i64} {
  func.func @_text_layer_kernel(%arg0: memref<8x32xf32, #tpu.memory_space<vmem>>, %arg1: memref<8x8xf32, #tpu.memory_space<vmem>>, %arg2: memref<8x8xf32, #tpu.memory_space<vmem>>, %arg3: memref<1x32xf32, #tpu.memory_space<vmem>>, %arg4: memref<32x96xf32, #tpu.memory_space<vmem>>, %arg5: memref<1x96xf32, #tpu.memory_space<vmem>>, %arg6: memref<32x32xf32, #tpu.memory_space<vmem>>, %arg7: memref<1x32xf32, #tpu.memory_space<vmem>>, %arg8: memref<32x128xf32, #tpu.memory_space<vmem>>, %arg9: memref<64x32xf32, #tpu.memory_space<vmem>>, %arg10: memref<8x32xf32, #tpu.memory_space<vmem>>) attributes {dimension_semantics = [], scalar_prefetch = 0 : i64, scratch_operands = 0 : i64, tpu.core_type = #tpu.core_type<tc>} {
    %c0 = arith.constant 0 : index
    %c0_0 = arith.constant 0 : index
    %0 = vector.load %arg0[%c0, %c0_0] : memref<8x32xf32, #tpu.memory_space<vmem>>, vector<8x32xf32>
    %c0_1 = arith.constant 0 : index
    %c0_2 = arith.constant 0 : index
    %1 = vector.load %arg1[%c0_1, %c0_2] : memref<8x8xf32, #tpu.memory_space<vmem>>, vector<8x8xf32>
    %c0_3 = arith.constant 0 : index
    %c0_4 = arith.constant 0 : index
    %2 = vector.load %arg2[%c0_3, %c0_4] : memref<8x8xf32, #tpu.memory_space<vmem>>, vector<8x8xf32>
    %3 = tpu.iota {dimensions = array<i32: 0>} : vector<8x8xi32>
    %4 = tpu.iota {dimensions = array<i32: 1>} : vector<8x8xi32>
    %5 = arith.cmpi sge, %3, %4 : vector<8x8xi32>
    %c0_5 = arith.constant 0 : index
    %c0_6 = arith.constant 0 : index
    %6 = vector.load %arg3[%c0_5, %c0_6] : memref<1x32xf32, #tpu.memory_space<vmem>>, vector<1x32xf32>
    %7 = arith.mulf %0, %0 : vector<8x32xf32>
    %cst = arith.constant dense<0.000000e+00> : vector<8xf32>
    %8 = vector.multi_reduction <add>, %7, %cst [1] : vector<8x32xf32> to vector<8xf32>
    %9 = vector.shape_cast %8 : vector<8xf32> to vector<8x1xf32>
    %cst_7 = arith.constant 3.200000e+01 : f32
    %10 = vector.broadcast %cst_7 : f32 to vector<8x1xf32>
    %11 = arith.divf %9, %10 : vector<8x1xf32>
    %cst_8 = arith.constant 9.99999997E-7 : f32
    %12 = vector.broadcast %cst_8 : f32 to vector<8x1xf32>
    %13 = arith.addf %11, %12 : vector<8x1xf32>
    %14 = math.rsqrt %13 : vector<8x1xf32>
    %15 = vector.broadcast %14 : vector<8x1xf32> to vector<8x32xf32>
    %16 = arith.mulf %0, %15 : vector<8x32xf32>
    %17 = vector.broadcast %6 : vector<1x32xf32> to vector<8x32xf32>
    %18 = arith.mulf %16, %17 : vector<8x32xf32>
    %c0_9 = arith.constant 0 : index
    %c0_10 = arith.constant 0 : index
    %19 = vector.load %arg4[%c0_9, %c0_10] : memref<32x96xf32, #tpu.memory_space<vmem>>, vector<32x96xf32>
    %cst_11 = arith.constant dense<0.000000e+00> : vector<8x96xf32>
    %20 = tpu.matmul %18, %19, %cst_11 {dimension_numbers = #tpu.dot_dimension_numbers<[1], [0], [0], [1], [0, 0, 1, 1], [], []>} : vector<8x32xf32>, vector<32x96xf32>, vector<8x96xf32> -> vector<8x96xf32>
    %c0_12 = arith.constant 0 : index
    %c0_13 = arith.constant 0 : index
    %21 = vector.load %arg5[%c0_12, %c0_13] : memref<1x96xf32, #tpu.memory_space<vmem>>, vector<1x96xf32>
    %22 = vector.broadcast %21 : vector<1x96xf32> to vector<8x96xf32>
    %23 = arith.addf %20, %22 : vector<8x96xf32>
    %24 = vector.extract_strided_slice %23 {offsets = [0, 0], sizes = [8, 32], strides = [1, 1]} : vector<8x96xf32> to vector<8x32xf32>
    %25 = vector.extract_strided_slice %23 {offsets = [0, 32], sizes = [8, 32], strides = [1, 1]} : vector<8x96xf32> to vector<8x32xf32>
    %26 = vector.extract_strided_slice %23 {offsets = [0, 64], sizes = [8, 32], strides = [1, 1]} : vector<8x96xf32> to vector<8x32xf32>
    %27 = vector.extract_strided_slice %24 {offsets = [0, 0], sizes = [8, 8], strides = [1, 1]} : vector<8x32xf32> to vector<8x8xf32>
    %28 = vector.extract_strided_slice %27 {offsets = [0, 0], sizes = [8, 4], strides = [1, 1]} : vector<8x8xf32> to vector<8x4xf32>
    %29 = vector.extract_strided_slice %27 {offsets = [0, 4], sizes = [8, 4], strides = [1, 1]} : vector<8x8xf32> to vector<8x4xf32>
    %30 = arith.mulf %27, %1 : vector<8x8xf32>
    %cst_14 = arith.constant 0.000000e+00 : f32
    %31 = vector.broadcast %cst_14 : f32 to vector<8x4xf32>
    %32 = arith.subf %31, %29 : vector<8x4xf32>
    %33 = tpu.concatenate %32, %28 in 1 : vector<8x4xf32>, vector<8x4xf32> -> vector<8x8xf32>
    %34 = arith.mulf %33, %2 : vector<8x8xf32>
    %35 = arith.addf %30, %34 : vector<8x8xf32>
    %36 = vector.extract_strided_slice %25 {offsets = [0, 0], sizes = [8, 8], strides = [1, 1]} : vector<8x32xf32> to vector<8x8xf32>
    %37 = vector.extract_strided_slice %36 {offsets = [0, 0], sizes = [8, 4], strides = [1, 1]} : vector<8x8xf32> to vector<8x4xf32>
    %38 = vector.extract_strided_slice %36 {offsets = [0, 4], sizes = [8, 4], strides = [1, 1]} : vector<8x8xf32> to vector<8x4xf32>
    %39 = arith.mulf %36, %1 : vector<8x8xf32>
    %cst_15 = arith.constant 0.000000e+00 : f32
    %40 = vector.broadcast %cst_15 : f32 to vector<8x4xf32>
    %41 = arith.subf %40, %38 : vector<8x4xf32>
    %42 = tpu.concatenate %41, %37 in 1 : vector<8x4xf32>, vector<8x4xf32> -> vector<8x8xf32>
    %43 = arith.mulf %42, %2 : vector<8x8xf32>
    %44 = arith.addf %39, %43 : vector<8x8xf32>
    %cst_16 = arith.constant dense<0.000000e+00> : vector<8x8xf32>
    %45 = tpu.matmul %35, %44, %cst_16 {dimension_numbers = #tpu.dot_dimension_numbers<[1], [1], [0], [0], [0, 0, 1, 0], [], []>} : vector<8x8xf32>, vector<8x8xf32>, vector<8x8xf32> -> vector<8x8xf32>
    %cst_17 = arith.constant 0.353553385 : f32
    %46 = vector.broadcast %cst_17 : f32 to vector<8x8xf32>
    %47 = arith.mulf %45, %46 : vector<8x8xf32>
    %cst_18 = arith.constant -1.000000e+30 : f32
    %48 = vector.broadcast %cst_18 : f32 to vector<8x8xf32>
    %49 = arith.select %5, %47, %48 : vector<8x8xi1>, vector<8x8xf32>
    %cst_19 = arith.constant dense<0xFF800000> : vector<8xf32>
    %50 = vector.multi_reduction <maximumf>, %49, %cst_19 [1] : vector<8x8xf32> to vector<8xf32>
    %51 = vector.shape_cast %50 : vector<8xf32> to vector<8x1xf32>
    %52 = vector.broadcast %51 : vector<8x1xf32> to vector<8x8xf32>
    %53 = arith.subf %49, %52 : vector<8x8xf32>
    %54 = math.exp %53 : vector<8x8xf32>
    %cst_20 = arith.constant dense<0.000000e+00> : vector<8xf32>
    %55 = vector.multi_reduction <add>, %54, %cst_20 [1] : vector<8x8xf32> to vector<8xf32>
    %56 = vector.shape_cast %55 : vector<8xf32> to vector<8x1xf32>
    %57 = tpu.reciprocal %56 {approx = true} : vector<8x1xf32> -> vector<8x1xf32>
    %58 = vector.broadcast %57 : vector<8x1xf32> to vector<8x8xf32>
    %59 = arith.mulf %54, %58 : vector<8x8xf32>
    %60 = vector.extract_strided_slice %26 {offsets = [0, 0], sizes = [8, 8], strides = [1, 1]} : vector<8x32xf32> to vector<8x8xf32>
    %cst_21 = arith.constant dense<0.000000e+00> : vector<8x8xf32>
    %61 = tpu.matmul %59, %60, %cst_21 {dimension_numbers = #tpu.dot_dimension_numbers<[1], [0], [0], [1], [0, 0, 1, 1], [], []>} : vector<8x8xf32>, vector<8x8xf32>, vector<8x8xf32> -> vector<8x8xf32>
    %62 = vector.extract_strided_slice %24 {offsets = [0, 8], sizes = [8, 8], strides = [1, 1]} : vector<8x32xf32> to vector<8x8xf32>
    %63 = vector.extract_strided_slice %62 {offsets = [0, 0], sizes = [8, 4], strides = [1, 1]} : vector<8x8xf32> to vector<8x4xf32>
    %64 = vector.extract_strided_slice %62 {offsets = [0, 4], sizes = [8, 4], strides = [1, 1]} : vector<8x8xf32> to vector<8x4xf32>
    %65 = arith.mulf %62, %1 : vector<8x8xf32>
    %cst_22 = arith.constant 0.000000e+00 : f32
    %66 = vector.broadcast %cst_22 : f32 to vector<8x4xf32>
    %67 = arith.subf %66, %64 : vector<8x4xf32>
    %68 = tpu.concatenate %67, %63 in 1 : vector<8x4xf32>, vector<8x4xf32> -> vector<8x8xf32>
    %69 = arith.mulf %68, %2 : vector<8x8xf32>
    %70 = arith.addf %65, %69 : vector<8x8xf32>
    %71 = vector.extract_strided_slice %25 {offsets = [0, 8], sizes = [8, 8], strides = [1, 1]} : vector<8x32xf32> to vector<8x8xf32>
    %72 = vector.extract_strided_slice %71 {offsets = [0, 0], sizes = [8, 4], strides = [1, 1]} : vector<8x8xf32> to vector<8x4xf32>
    %73 = vector.extract_strided_slice %71 {offsets = [0, 4], sizes = [8, 4], strides = [1, 1]} : vector<8x8xf32> to vector<8x4xf32>
    %74 = arith.mulf %71, %1 : vector<8x8xf32>
    %cst_23 = arith.constant 0.000000e+00 : f32
    %75 = vector.broadcast %cst_23 : f32 to vector<8x4xf32>
    %76 = arith.subf %75, %73 : vector<8x4xf32>
    %77 = tpu.concatenate %76, %72 in 1 : vector<8x4xf32>, vector<8x4xf32> -> vector<8x8xf32>
    %78 = arith.mulf %77, %2 : vector<8x8xf32>
    %79 = arith.addf %74, %78 : vector<8x8xf32>
    %cst_24 = arith.constant dense<0.000000e+00> : vector<8x8xf32>
    %80 = tpu.matmul %70, %79, %cst_24 {dimension_numbers = #tpu.dot_dimension_numbers<[1], [1], [0], [0], [0, 0, 1, 0], [], []>} : vector<8x8xf32>, vector<8x8xf32>, vector<8x8xf32> -> vector<8x8xf32>
    %cst_25 = arith.constant 0.353553385 : f32
    %81 = vector.broadcast %cst_25 : f32 to vector<8x8xf32>
    %82 = arith.mulf %80, %81 : vector<8x8xf32>
    %cst_26 = arith.constant -1.000000e+30 : f32
    %83 = vector.broadcast %cst_26 : f32 to vector<8x8xf32>
    %84 = arith.select %5, %82, %83 : vector<8x8xi1>, vector<8x8xf32>
    %cst_27 = arith.constant dense<0xFF800000> : vector<8xf32>
    %85 = vector.multi_reduction <maximumf>, %84, %cst_27 [1] : vector<8x8xf32> to vector<8xf32>
    %86 = vector.shape_cast %85 : vector<8xf32> to vector<8x1xf32>
    %87 = vector.broadcast %86 : vector<8x1xf32> to vector<8x8xf32>
    %88 = arith.subf %84, %87 : vector<8x8xf32>
    %89 = math.exp %88 : vector<8x8xf32>
    %cst_28 = arith.constant dense<0.000000e+00> : vector<8xf32>
    %90 = vector.multi_reduction <add>, %89, %cst_28 [1] : vector<8x8xf32> to vector<8xf32>
    %91 = vector.shape_cast %90 : vector<8xf32> to vector<8x1xf32>
    %92 = tpu.reciprocal %91 {approx = true} : vector<8x1xf32> -> vector<8x1xf32>
    %93 = vector.broadcast %92 : vector<8x1xf32> to vector<8x8xf32>
    %94 = arith.mulf %89, %93 : vector<8x8xf32>
    %95 = vector.extract_strided_slice %26 {offsets = [0, 8], sizes = [8, 8], strides = [1, 1]} : vector<8x32xf32> to vector<8x8xf32>
    %cst_29 = arith.constant dense<0.000000e+00> : vector<8x8xf32>
    %96 = tpu.matmul %94, %95, %cst_29 {dimension_numbers = #tpu.dot_dimension_numbers<[1], [0], [0], [1], [0, 0, 1, 1], [], []>} : vector<8x8xf32>, vector<8x8xf32>, vector<8x8xf32> -> vector<8x8xf32>
    %97 = vector.extract_strided_slice %24 {offsets = [0, 16], sizes = [8, 8], strides = [1, 1]} : vector<8x32xf32> to vector<8x8xf32>
    %98 = vector.extract_strided_slice %97 {offsets = [0, 0], sizes = [8, 4], strides = [1, 1]} : vector<8x8xf32> to vector<8x4xf32>
    %99 = vector.extract_strided_slice %97 {offsets = [0, 4], sizes = [8, 4], strides = [1, 1]} : vector<8x8xf32> to vector<8x4xf32>
    %100 = arith.mulf %97, %1 : vector<8x8xf32>
    %cst_30 = arith.constant 0.000000e+00 : f32
    %101 = vector.broadcast %cst_30 : f32 to vector<8x4xf32>
    %102 = arith.subf %101, %99 : vector<8x4xf32>
    %103 = tpu.concatenate %102, %98 in 1 : vector<8x4xf32>, vector<8x4xf32> -> vector<8x8xf32>
    %104 = arith.mulf %103, %2 : vector<8x8xf32>
    %105 = arith.addf %100, %104 : vector<8x8xf32>
    %106 = vector.extract_strided_slice %25 {offsets = [0, 16], sizes = [8, 8], strides = [1, 1]} : vector<8x32xf32> to vector<8x8xf32>
    %107 = vector.extract_strided_slice %106 {offsets = [0, 0], sizes = [8, 4], strides = [1, 1]} : vector<8x8xf32> to vector<8x4xf32>
    %108 = vector.extract_strided_slice %106 {offsets = [0, 4], sizes = [8, 4], strides = [1, 1]} : vector<8x8xf32> to vector<8x4xf32>
    %109 = arith.mulf %106, %1 : vector<8x8xf32>
    %cst_31 = arith.constant 0.000000e+00 : f32
    %110 = vector.broadcast %cst_31 : f32 to vector<8x4xf32>
    %111 = arith.subf %110, %108 : vector<8x4xf32>
    %112 = tpu.concatenate %111, %107 in 1 : vector<8x4xf32>, vector<8x4xf32> -> vector<8x8xf32>
    %113 = arith.mulf %112, %2 : vector<8x8xf32>
    %114 = arith.addf %109, %113 : vector<8x8xf32>
    %cst_32 = arith.constant dense<0.000000e+00> : vector<8x8xf32>
    %115 = tpu.matmul %105, %114, %cst_32 {dimension_numbers = #tpu.dot_dimension_numbers<[1], [1], [0], [0], [0, 0, 1, 0], [], []>} : vector<8x8xf32>, vector<8x8xf32>, vector<8x8xf32> -> vector<8x8xf32>
    %cst_33 = arith.constant 0.353553385 : f32
    %116 = vector.broadcast %cst_33 : f32 to vector<8x8xf32>
    %117 = arith.mulf %115, %116 : vector<8x8xf32>
    %cst_34 = arith.constant -1.000000e+30 : f32
    %118 = vector.broadcast %cst_34 : f32 to vector<8x8xf32>
    %119 = arith.select %5, %117, %118 : vector<8x8xi1>, vector<8x8xf32>
    %cst_35 = arith.constant dense<0xFF800000> : vector<8xf32>
    %120 = vector.multi_reduction <maximumf>, %119, %cst_35 [1] : vector<8x8xf32> to vector<8xf32>
    %121 = vector.shape_cast %120 : vector<8xf32> to vector<8x1xf32>
    %122 = vector.broadcast %121 : vector<8x1xf32> to vector<8x8xf32>
    %123 = arith.subf %119, %122 : vector<8x8xf32>
    %124 = math.exp %123 : vector<8x8xf32>
    %cst_36 = arith.constant dense<0.000000e+00> : vector<8xf32>
    %125 = vector.multi_reduction <add>, %124, %cst_36 [1] : vector<8x8xf32> to vector<8xf32>
    %126 = vector.shape_cast %125 : vector<8xf32> to vector<8x1xf32>
    %127 = tpu.reciprocal %126 {approx = true} : vector<8x1xf32> -> vector<8x1xf32>
    %128 = vector.broadcast %127 : vector<8x1xf32> to vector<8x8xf32>
    %129 = arith.mulf %124, %128 : vector<8x8xf32>
    %130 = vector.extract_strided_slice %26 {offsets = [0, 16], sizes = [8, 8], strides = [1, 1]} : vector<8x32xf32> to vector<8x8xf32>
    %cst_37 = arith.constant dense<0.000000e+00> : vector<8x8xf32>
    %131 = tpu.matmul %129, %130, %cst_37 {dimension_numbers = #tpu.dot_dimension_numbers<[1], [0], [0], [1], [0, 0, 1, 1], [], []>} : vector<8x8xf32>, vector<8x8xf32>, vector<8x8xf32> -> vector<8x8xf32>
    %132 = vector.extract_strided_slice %24 {offsets = [0, 24], sizes = [8, 8], strides = [1, 1]} : vector<8x32xf32> to vector<8x8xf32>
    %133 = vector.extract_strided_slice %132 {offsets = [0, 0], sizes = [8, 4], strides = [1, 1]} : vector<8x8xf32> to vector<8x4xf32>
    %134 = vector.extract_strided_slice %132 {offsets = [0, 4], sizes = [8, 4], strides = [1, 1]} : vector<8x8xf32> to vector<8x4xf32>
    %135 = arith.mulf %132, %1 : vector<8x8xf32>
    %cst_38 = arith.constant 0.000000e+00 : f32
    %136 = vector.broadcast %cst_38 : f32 to vector<8x4xf32>
    %137 = arith.subf %136, %134 : vector<8x4xf32>
    %138 = tpu.concatenate %137, %133 in 1 : vector<8x4xf32>, vector<8x4xf32> -> vector<8x8xf32>
    %139 = arith.mulf %138, %2 : vector<8x8xf32>
    %140 = arith.addf %135, %139 : vector<8x8xf32>
    %141 = vector.extract_strided_slice %25 {offsets = [0, 24], sizes = [8, 8], strides = [1, 1]} : vector<8x32xf32> to vector<8x8xf32>
    %142 = vector.extract_strided_slice %141 {offsets = [0, 0], sizes = [8, 4], strides = [1, 1]} : vector<8x8xf32> to vector<8x4xf32>
    %143 = vector.extract_strided_slice %141 {offsets = [0, 4], sizes = [8, 4], strides = [1, 1]} : vector<8x8xf32> to vector<8x4xf32>
    %144 = arith.mulf %141, %1 : vector<8x8xf32>
    %cst_39 = arith.constant 0.000000e+00 : f32
    %145 = vector.broadcast %cst_39 : f32 to vector<8x4xf32>
    %146 = arith.subf %145, %143 : vector<8x4xf32>
    %147 = tpu.concatenate %146, %142 in 1 : vector<8x4xf32>, vector<8x4xf32> -> vector<8x8xf32>
    %148 = arith.mulf %147, %2 : vector<8x8xf32>
    %149 = arith.addf %144, %148 : vector<8x8xf32>
    %cst_40 = arith.constant dense<0.000000e+00> : vector<8x8xf32>
    %150 = tpu.matmul %140, %149, %cst_40 {dimension_numbers = #tpu.dot_dimension_numbers<[1], [1], [0], [0], [0, 0, 1, 0], [], []>} : vector<8x8xf32>, vector<8x8xf32>, vector<8x8xf32> -> vector<8x8xf32>
    %cst_41 = arith.constant 0.353553385 : f32
    %151 = vector.broadcast %cst_41 : f32 to vector<8x8xf32>
    %152 = arith.mulf %150, %151 : vector<8x8xf32>
    %cst_42 = arith.constant -1.000000e+30 : f32
    %153 = vector.broadcast %cst_42 : f32 to vector<8x8xf32>
    %154 = arith.select %5, %152, %153 : vector<8x8xi1>, vector<8x8xf32>
    %cst_43 = arith.constant dense<0xFF800000> : vector<8xf32>
    %155 = vector.multi_reduction <maximumf>, %154, %cst_43 [1] : vector<8x8xf32> to vector<8xf32>
    %156 = vector.shape_cast %155 : vector<8xf32> to vector<8x1xf32>
    %157 = vector.broadcast %156 : vector<8x1xf32> to vector<8x8xf32>
    %158 = arith.subf %154, %157 : vector<8x8xf32>
    %159 = math.exp %158 : vector<8x8xf32>
    %cst_44 = arith.constant dense<0.000000e+00> : vector<8xf32>
    %160 = vector.multi_reduction <add>, %159, %cst_44 [1] : vector<8x8xf32> to vector<8xf32>
    %161 = vector.shape_cast %160 : vector<8xf32> to vector<8x1xf32>
    %162 = tpu.reciprocal %161 {approx = true} : vector<8x1xf32> -> vector<8x1xf32>
    %163 = vector.broadcast %162 : vector<8x1xf32> to vector<8x8xf32>
    %164 = arith.mulf %159, %163 : vector<8x8xf32>
    %165 = vector.extract_strided_slice %26 {offsets = [0, 24], sizes = [8, 8], strides = [1, 1]} : vector<8x32xf32> to vector<8x8xf32>
    %cst_45 = arith.constant dense<0.000000e+00> : vector<8x8xf32>
    %166 = tpu.matmul %164, %165, %cst_45 {dimension_numbers = #tpu.dot_dimension_numbers<[1], [0], [0], [1], [0, 0, 1, 1], [], []>} : vector<8x8xf32>, vector<8x8xf32>, vector<8x8xf32> -> vector<8x8xf32>
    %167 = tpu.concatenate %61, %96, %131, %166 in 1 : vector<8x8xf32>, vector<8x8xf32>, vector<8x8xf32>, vector<8x8xf32> -> vector<8x32xf32>
    %c0_46 = arith.constant 0 : index
    %c0_47 = arith.constant 0 : index
    %168 = vector.load %arg6[%c0_46, %c0_47] : memref<32x32xf32, #tpu.memory_space<vmem>>, vector<32x32xf32>
    %cst_48 = arith.constant dense<0.000000e+00> : vector<8x32xf32>
    %169 = tpu.matmul %167, %168, %cst_48 {dimension_numbers = #tpu.dot_dimension_numbers<[1], [0], [0], [1], [0, 0, 1, 1], [], []>} : vector<8x32xf32>, vector<32x32xf32>, vector<8x32xf32> -> vector<8x32xf32>
    %170 = arith.addf %0, %169 : vector<8x32xf32>
    %c0_49 = arith.constant 0 : index
    %c0_50 = arith.constant 0 : index
    %171 = vector.load %arg7[%c0_49, %c0_50] : memref<1x32xf32, #tpu.memory_space<vmem>>, vector<1x32xf32>
    %172 = arith.mulf %170, %170 : vector<8x32xf32>
    %cst_51 = arith.constant dense<0.000000e+00> : vector<8xf32>
    %173 = vector.multi_reduction <add>, %172, %cst_51 [1] : vector<8x32xf32> to vector<8xf32>
    %174 = vector.shape_cast %173 : vector<8xf32> to vector<8x1xf32>
    %cst_52 = arith.constant 3.200000e+01 : f32
    %175 = vector.broadcast %cst_52 : f32 to vector<8x1xf32>
    %176 = arith.divf %174, %175 : vector<8x1xf32>
    %cst_53 = arith.constant 9.99999997E-7 : f32
    %177 = vector.broadcast %cst_53 : f32 to vector<8x1xf32>
    %178 = arith.addf %176, %177 : vector<8x1xf32>
    %179 = math.rsqrt %178 : vector<8x1xf32>
    %180 = vector.broadcast %179 : vector<8x1xf32> to vector<8x32xf32>
    %181 = arith.mulf %170, %180 : vector<8x32xf32>
    %182 = vector.broadcast %171 : vector<1x32xf32> to vector<8x32xf32>
    %183 = arith.mulf %181, %182 : vector<8x32xf32>
    %c0_54 = arith.constant 0 : index
    %c0_55 = arith.constant 0 : index
    %184 = vector.load %arg8[%c0_54, %c0_55] : memref<32x128xf32, #tpu.memory_space<vmem>>, vector<32x128xf32>
    %cst_56 = arith.constant dense<0.000000e+00> : vector<8x128xf32>
    %185 = tpu.matmul %183, %184, %cst_56 {dimension_numbers = #tpu.dot_dimension_numbers<[1], [0], [0], [1], [0, 0, 1, 1], [], []>} : vector<8x32xf32>, vector<32x128xf32>, vector<8x128xf32> -> vector<8x128xf32>
    %186 = vector.extract_strided_slice %185 {offsets = [0, 0], sizes = [8, 64], strides = [1, 1]} : vector<8x128xf32> to vector<8x64xf32>
    %187 = vector.extract_strided_slice %185 {offsets = [0, 64], sizes = [8, 64], strides = [1, 1]} : vector<8x128xf32> to vector<8x64xf32>
    %188 = arith.negf %186 : vector<8x64xf32>
    %189 = math.exp %188 : vector<8x64xf32>
    %cst_57 = arith.constant 1.000000e+00 : f32
    %190 = vector.broadcast %cst_57 : f32 to vector<8x64xf32>
    %191 = arith.addf %190, %189 : vector<8x64xf32>
    %192 = arith.divf %190, %191 : vector<8x64xf32>
    %193 = arith.mulf %186, %192 : vector<8x64xf32>
    %194 = arith.mulf %193, %187 : vector<8x64xf32>
    %c0_58 = arith.constant 0 : index
    %c0_59 = arith.constant 0 : index
    %195 = vector.load %arg9[%c0_58, %c0_59] : memref<64x32xf32, #tpu.memory_space<vmem>>, vector<64x32xf32>
    %cst_60 = arith.constant dense<0.000000e+00> : vector<8x32xf32>
    %196 = tpu.matmul %194, %195, %cst_60 {dimension_numbers = #tpu.dot_dimension_numbers<[1], [0], [0], [1], [0, 0, 1, 1], [], []>} : vector<8x64xf32>, vector<64x32xf32>, vector<8x32xf32> -> vector<8x32xf32>
    %197 = arith.addf %170, %196 : vector<8x32xf32>
    %c0_61 = arith.constant 0 : index
    %c0_62 = arith.constant 0 : index
    %198 = vector.load %arg10[%c0_61, %c0_62] : memref<8x32xf32, #tpu.memory_space<vmem>>, vector<8x32xf32>
    tpu.vector_store %arg10[%c0_61, %c0_62], %197 {strides = array<i32>} : memref<8x32xf32, #tpu.memory_space<vmem>>, vector<8x32xf32>,
    return
  }
}

module attributes {stable_mosaic.version = 11 : i64} {
  func.func @_final_norm_head_kernel(%arg0: memref<8x32xf32, #tpu.memory_space<vmem>>, %arg1: memref<1x32xf32, #tpu.memory_space<vmem>>, %arg2: memref<32x128xf32, #tpu.memory_space<vmem>>, %arg3: memref<8x32xf32, #tpu.memory_space<vmem>>, %arg4: memref<8x128xf32, #tpu.memory_space<vmem>>) attributes {dimension_semantics = [], scalar_prefetch = 0 : i64, scratch_operands = 0 : i64, tpu.core_type = #tpu.core_type<tc>} {
    %c0 = arith.constant 0 : index
    %c0_0 = arith.constant 0 : index
    %0 = vector.load %arg0[%c0, %c0_0] : memref<8x32xf32, #tpu.memory_space<vmem>>, vector<8x32xf32>
    %c0_1 = arith.constant 0 : index
    %c0_2 = arith.constant 0 : index
    %1 = vector.load %arg1[%c0_1, %c0_2] : memref<1x32xf32, #tpu.memory_space<vmem>>, vector<1x32xf32>
    %2 = arith.mulf %0, %0 : vector<8x32xf32>
    %cst = arith.constant dense<0.000000e+00> : vector<8xf32>
    %3 = vector.multi_reduction <add>, %2, %cst [1] : vector<8x32xf32> to vector<8xf32>
    %4 = vector.shape_cast %3 : vector<8xf32> to vector<8x1xf32>
    %cst_3 = arith.constant 3.200000e+01 : f32
    %5 = vector.broadcast %cst_3 : f32 to vector<8x1xf32>
    %6 = arith.divf %4, %5 : vector<8x1xf32>
    %cst_4 = arith.constant 9.99999997E-7 : f32
    %7 = vector.broadcast %cst_4 : f32 to vector<8x1xf32>
    %8 = arith.addf %6, %7 : vector<8x1xf32>
    %9 = math.rsqrt %8 : vector<8x1xf32>
    %10 = vector.broadcast %9 : vector<8x1xf32> to vector<8x32xf32>
    %11 = arith.mulf %0, %10 : vector<8x32xf32>
    %12 = vector.broadcast %1 : vector<1x32xf32> to vector<8x32xf32>
    %13 = arith.mulf %11, %12 : vector<8x32xf32>
    %c0_5 = arith.constant 0 : index
    %c0_6 = arith.constant 0 : index
    %14 = vector.load %arg3[%c0_5, %c0_6] : memref<8x32xf32, #tpu.memory_space<vmem>>, vector<8x32xf32>
    tpu.vector_store %arg3[%c0_5, %c0_6], %13 {strides = array<i32>} : memref<8x32xf32, #tpu.memory_space<vmem>>, vector<8x32xf32>,
    %c0_7 = arith.constant 0 : index
    %c0_8 = arith.constant 0 : index
    %15 = vector.load %arg2[%c0_7, %c0_8] : memref<32x128xf32, #tpu.memory_space<vmem>>, vector<32x128xf32>
    %cst_9 = arith.constant dense<0.000000e+00> : vector<8x128xf32>
    %16 = tpu.matmul %13, %15, %cst_9 {dimension_numbers = #tpu.dot_dimension_numbers<[1], [0], [0], [1], [0, 0, 1, 1], [], []>} : vector<8x32xf32>, vector<32x128xf32>, vector<8x128xf32> -> vector<8x128xf32>
    %c0_10 = arith.constant 0 : index
    %c0_11 = arith.constant 0 : index
    %17 = vector.load %arg4[%c0_10, %c0_11] : memref<8x128xf32, #tpu.memory_space<vmem>>, vector<8x128xf32>
    tpu.vector_store %arg4[%c0_10, %c0_11], %16 {strides = array<i32>} : memref<8x128xf32, #tpu.memory_space<vmem>>, vector<8x128xf32>,
    return
  }
}

</mosaic_0001>

<bundles_post_ra>
// kernel: forward.8
= control target key start
LH: loop header
LB: loop body
LE: loop exit
PB: predicated region body
PF: predicated region fallthrough
CT: control target
= control target key end

     0   :  { %vm28_vm0 = vcmask 195584   ;;  %vm162_vm1 = vcmask 261120   ;;  %s271_s1 = inlined_call_operand.vmem [shape: f32[24,32], index: 1, kind: input, shape index: {}]   ;;  %s272_s0 = inlined_call_operand.vmem [shape: f32[32,24], index: 0, kind: input, shape index: {}]   ;;  %s273_s2 = inlined_call_operand.vmem [shape: f32[1,32], index: 2, kind: input, shape index: {}]   ;;  %s274_s3 = inlined_call_operand.vmem [shape: f32[32,32], index: 3, kind: output, shape index: {}]  }
   0x1   :  { %v18_v0 = vld [vmem:[%s271_s1] sm:$0xff]  ;;  %v19_v1 = vld [vmem:[%s271_s1 + $0x8] sm:$0xff]  ;;  %v16_v4 = vld [vmem:[%s272_s0 + $0x10] sm:$0xff] }
   0x2   :  { %v195_v2 = vpack.c.bf16 %v19_v1, %v18_v0  ;;  %v14_v3 = vld [vmem:[%s272_s0] sm:$0xff]  ;;  %v20_v5 = vld [vmem:[%s271_s1 + $0x10] sm:$0xff]  ;;  %192 = vmatprep.mubr.msk.f32.mxu1 %vm28_vm0, %v16_v4  ;;  %v15_v6 = vld [vmem:[%s272_s0 + $0x8] sm:$0xff] }
   0x3   :  { %189 = vmatprep.mubr.msk.f32.mxu0 %vm28_vm0, %v14_v3  ;;  %v17_v7 = vld [vmem:[%s272_s0 + $0x18] sm:$0xff]  ;;  %v171_v8 = vld [vmem:[%s273_s2] ss:$0 sm:$0xff] }
   0x4   :  { %196 = vmatprep.subr.bf16.mxu0 %v195_v2  ;;  %199 = vmatprep.subr.bf16.mxu1 %v195_v2 }
   0x5   :  { %198 = vmatpush3.bf16.msra.mxu0 %v195_v2  ;;  %201 = vmatpush3.bf16.msra.mxu1 %v195_v2 }
   0x6   :  { %187 = vmatprep.subr.mxu0 %v20_v5  ;;  %200 = vmatprep.subr.mxu1 %v20_v5 }
   0x9   :  { %188 = vmatpush3.msra.mxu0 %v20_v5  ;;  %202 = vmatpush3.msra.mxu1 %v20_v5 }
   0xa   :  { %190 = vmatmul.mubr.msk.f32.vlgmr.msra.gmra.mrb[0].mxu0 %vm28_vm0, %v15_v6  ;;  %193 = vmatmul.mubr.msk.f32.vlgmr.msra.gmra.mrb[0].mxu1 %vm28_vm0, %v17_v7 }
  0xdd   :  { %v191_v9 = vpop.f32.mrb[0].mxu0  ;;  %v194_v10 = vpop.f32.mrb[0].mxu1 }
  0xde   :  { %v113_v11 = vadd.f32 %v191_v9, %v171_v8  ;;  %v123_v12 = vadd.f32 %v194_v10, %v171_v8  ;;  %v107_v13 = vpop.f32.mrb[1].mxu0  ;;  %v117_v14 = vpop.f32.mrb[1].mxu1 }
  0xdf   :  { %v108_v15 = vadd.f32 %v171_v8, %v107_v13  ;;  %v118_v16 = vadd.f32 %v171_v8, %v117_v14 }
  0xe0   :  { %v127_v17 = vmul.f32 %v113_v11, %v113_v11  ;;  %v129_v18 = vmul.f32 %v123_v12, %v123_v12 }
  0xe1   :  { %v126_v19 = vmul.f32 %v108_v15, %v108_v15  ;;  %v128_v20 = vmul.f32 %v118_v16, %v118_v16 }
  0xe2   :  { %v131_v21 = vmul.f32 %v127_v17, %v113_v11  ;;  %v133_v22 = vmul.f32 %v129_v18, %v123_v12 }
  0xe3   :  { %v130_v23 = vmul.f32 %v126_v19, %v108_v15  ;;  %v132_v24 = vmul.f32 %v128_v20, %v118_v16 }
  0xe4   :  { %v135_v25 = vmul.f32 0.044715, %v131_v21  ;;  %v137_v26 = vmul.f32 0.044715, %v133_v22 }
  0xe5   :  { %v134_v27 = vmul.f32 0.044715, %v130_v23  ;;  %v136_v28 = vmul.f32 0.044715, %v132_v24 }
  0xe6   :  { %v139_v29 = vadd.f32 %v135_v25, %v113_v11  ;;  %v141_v30 = vadd.f32 %v137_v26, %v123_v12 }
  0xe7   :  { %v138_v31 = vadd.f32 %v134_v27, %v108_v15  ;;  %v140_v32 = vadd.f32 %v136_v28, %v118_v16 }
  0xe8   :  { %v143_v33 = vmul.f32 0.7978846, %v139_v29  ;;  %v145_v34 = vmul.f32 0.7978846, %v141_v30 }
  0xe9   :  { %v142_v35 = vmul.f32 0.7978846, %v138_v31  ;;  %v144_v36 = vmul.f32 0.7978846, %v140_v32 }
  0xea   :  { %203 = vtanh.f32 %v143_v33 }
  0xeb   :  { %205 = vtanh.f32 %v145_v34 }
  0xec   :  { %207 = vtanh.f32 %v142_v35 }
  0xed   :  { %209 = vtanh.f32 %v144_v36 }
  0xf4   :  { %v204_v37 = vpop.eup %203 }
  0xf5   :  { %v206_v38 = vpop.eup %205  ;;  %v151_v39 = vadd.f32 1.0, %v204_v37 }
  0xf6   :  { %v208_v40 = vpop.eup %207  ;;  %v153_v41 = vadd.f32 1.0, %v206_v38 }
  0xf7   :  { %v210_v42 = vpop.eup %209  ;;  %v155_v43 = vmul.f32 0.5, %v151_v39  ;;  %v150_v44 = vadd.f32 1.0, %v208_v40 }
  0xf8   :  { %v157_v45 = vmul.f32 0.5, %v153_v41  ;;  %v152_v46 = vadd.f32 1.0, %v210_v42 }
  0xf9   :  { %v159_v47 = vmul.f32 %v155_v43, %v113_v11  ;;  %v154_v48 = vmul.f32 0.5, %v150_v44 }
  0xfa   :  { %v161_v49 = vmul.f32 %v157_v45, %v123_v12  ;;  %v156_v50 = vmul.f32 0.5, %v152_v46 }
  0xfb   :  { %164 = vst.msk [vmem:[%s274_s3 + $0x8] sm:$0xff] %vm162_vm1, %v159_v47  ;;  %v158_v51 = vmul.f32 %v154_v48, %v108_v15 }
  0xfc   :  { %166 = vst.msk [vmem:[%s274_s3 + $0x18] sm:$0xff] %vm162_vm1, %v161_v49  ;;  %v160_v52 = vmul.f32 %v156_v50, %v118_v16 }
  0xfd   :  { %163 = vst.msk [vmem:[%s274_s3] sm:$0xff] %vm162_vm1, %v158_v51 }
  0xfe   :  { %165 = vst.msk [vmem:[%s274_s3 + $0x10] sm:$0xff] %vm162_vm1, %v160_v52 }

// kernel: forward.9
= control target key start
LH: loop header
LB: loop body
LE: loop exit
PB: predicated region body
PF: predicated region fallthrough
CT: control target
= control target key end

     0   :  { %vm35_vm0 = vcmask 785408   ;;  %vm135_vm1 = vcmask 261120   ;;  %s287_s1 = inlined_call_operand.vmem [shape: f32[96,32], index: 1, kind: input, shape index: {}]   ;;  %s288_s0 = inlined_call_operand.vmem [shape: f32[16,96], index: 0, kind: input, shape index: {}]   ;;  %s289_s2 = inlined_call_operand.vmem [shape: f32[1,32], index: 2, kind: input, shape index: {}]   ;;  %s290_s3 = inlined_call_operand.vmem [shape: f32[16,32], index: 3, kind: output, shape index: {}]  }
   0x1   :  { %v16_v0 = vld [vmem:[%s287_s1] sm:$0xff]  ;;  %v17_v1 = vld [vmem:[%s287_s1 + $0x8] sm:$0xff]  ;;  %v18_v2 = vld [vmem:[%s287_s1 + $0x10] sm:$0xff] }
   0x2   :  { %v186_v3 = vpack.c.bf16 %v17_v1, %v16_v0  ;;  %v19_v4 = vld [vmem:[%s287_s1 + $0x18] sm:$0xff]  ;;  %v20_v6 = vld [vmem:[%s287_s1 + $0x20] sm:$0xff]  ;;  %v21_v7 = vld [vmem:[%s287_s1 + $0x28] sm:$0xff] }
   0x3   :  { %v190_v5 = vpack.c.bf16 %v19_v4, %v18_v2  ;;  %v14_v8 = vld [vmem:[%s288_s0] sm:$0xff]  ;;  %v194_v9 = vpack.c.bf16 %v21_v7, %v20_v6  ;;  %v22_v10 = vld [vmem:[%s287_s1 + $0x30] sm:$0xff]  ;;  %v23_v11 = vld [vmem:[%s287_s1 + $0x38] sm:$0xff] }
   0x4   :  { %187 = vmatprep.subr.bf16.mxu0 %v186_v3  ;;  %183 = vmatprep.mubr.msk.f32.mxu0 %vm35_vm0, %v14_v8  ;;  %v198_v12 = vpack.c.bf16 %v23_v11, %v22_v10  ;;  %v24_v13 = vld [vmem:[%s287_s1 + $0x40] sm:$0xff]  ;;  %v25_v14 = vld [vmem:[%s287_s1 + $0x48] sm:$0xff]  ;;  %v26_v16 = vld [vmem:[%s287_s1 + $0x50] sm:$0xff] }
   0x5   :  { %189 = vmatpush3.bf16.msra.mxu0 %v186_v3  ;;  %v202_v15 = vpack.c.bf16 %v25_v14, %v24_v13  ;;  %v27_v17 = vld [vmem:[%s287_s1 + $0x58] sm:$0xff]  ;;  %v15_v19 = vld [vmem:[%s288_s0 + $0x8] sm:$0xff]  ;;  %v142_v20 = vld [vmem:[%s289_s2] ss:$0 sm:$0xff] }
   0x6   :  { %191 = vmatprep.subr.bf16.mxu0 %v190_v5  ;;  %v206_v18 = vpack.c.bf16 %v27_v17, %v26_v16 }
   0x9   :  { %193 = vmatpush3.bf16.msra.mxu0 %v190_v5 }
   0xa   :  { %195 = vmatprep.subr.bf16.mxu0 %v194_v9 }
   0xd   :  { %197 = vmatpush3.bf16.msra.mxu0 %v194_v9 }
   0xe   :  { %199 = vmatprep.subr.bf16.mxu0 %v198_v12 }
  0x11   :  { %201 = vmatpush3.bf16.msra.mxu0 %v198_v12 }
  0x12   :  { %203 = vmatprep.subr.bf16.mxu0 %v202_v15 }
  0x15   :  { %205 = vmatpush3.bf16.msra.mxu0 %v202_v15 }
  0x16   :  { %207 = vmatprep.subr.bf16.mxu0 %v206_v18 }
  0x19   :  { %209 = vmatpush3.bf16.msra.mxu0 %v206_v18 }
  0x1c   :  { %184 = vmatmul.mubr.msk.f32.vlgmr.msra.gmra.mrb[0].mxu0 %vm35_vm0, %v15_v19 }
  0xef   :  { %v185_v21 = vpop.f32.mrb[0].mxu0 }
  0xf0   :  { %v114_v22 = vadd.f32 %v185_v21, %v142_v20  ;;  %v108_v23 = vpop.f32.mrb[1].mxu0 }
  0xf1   :  { %v109_v24 = vadd.f32 %v142_v20, %v108_v23 }
  0xf2   :  { %v118_v25 = vmul.f32 %v114_v22, %v114_v22 }
  0xf3   :  { %v117_v26 = vmul.f32 %v109_v24, %v109_v24 }
  0xf4   :  { %v120_v27 = vmul.f32 %v118_v25, %v114_v22 }
  0xf5   :  { %v119_v28 = vmul.f32 %v117_v26, %v109_v24 }
  0xf6   :  { %v122_v29 = vmul.f32 0.044715, %v120_v27 }
  0xf7   :  { %v121_v30 = vmul.f32 0.044715, %v119_v28 }
  0xf8   :  { %v124_v31 = vadd.f32 %v122_v29, %v114_v22 }
  0xf9   :  { %v123_v32 = vadd.f32 %v121_v30, %v109_v24 }
  0xfa   :  { %v126_v33 = vmul.f32 0.7978846, %v124_v31 }
  0xfb   :  { %v125_v34 = vmul.f32 0.7978846, %v123_v32 }
  0xfc   :  { %210 = vtanh.f32 %v126_v33 }
  0xfd   :  { %212 = vtanh.f32 %v125_v34 }
 0x106   :  { %v211_v35 = vpop.eup %210 }
 0x107   :  { %v213_v36 = vpop.eup %212  ;;  %v130_v37 = vadd.f32 1.0, %v211_v35 }
 0x108   :  { %v129_v38 = vadd.f32 1.0, %v213_v36 }
 0x109   :  { %v132_v39 = vmul.f32 0.5, %v130_v37 }
 0x10a   :  { %v131_v40 = vmul.f32 0.5, %v129_v38 }
 0x10b   :  { %v134_v41 = vmul.f32 %v132_v39, %v114_v22 }
 0x10c   :  { %v133_v42 = vmul.f32 %v131_v40, %v109_v24 }
 0x10d   :  { %137 = vst.msk [vmem:[%s290_s3 + $0x8] sm:$0xff] %vm135_vm1, %v134_v41 }
 0x10e   :  { %136 = vst.msk [vmem:[%s290_s3] sm:$0xff] %vm135_vm1, %v133_v42 }

// kernel: forward.12
= control target key start
LH: loop header
LB: loop body
LE: loop exit
PB: predicated region body
PF: predicated region fallthrough
CT: control target
= control target key end

     0   :  { %vm29_vm0 = vcmask 261120   ;;  %v178_v10 = vmov 0.0|0.0   ;;  %vm179_vm1 = vmmov 0   ;;  %v180_v14 = vmov 0.0   ;;  %s250_s0 = inlined_call_operand.vmem [shape: f32[8,32], index: 0, kind: input, shape index: {}]   ;;  %s251_s1 = inlined_call_operand.vmem [shape: f32[8,32], index: 1, kind: input, shape index: {}]   ;;  %s252_s4 = inlined_call_operand.vmem [shape: f32[32,32], index: 4, kind: input, shape index: {}]   ;;  %s253_s2 = inlined_call_operand.vmem [shape: f32[1,32], index: 2, kind: input, shape index: {}]   ;;  %s254_s3 = inlined_call_operand.vmem [shape: f32[1,32], index: 3, kind: input, shape index: {}]   ;;  %s255_s5 = inlined_call_operand.vmem [shape: f32[1,32], index: 5, kind: input, shape index: {}]   ;;  %s256_s6 = inlined_call_operand.vmem [shape: f32[8,32], index: 6, kind: output, shape index: {}]  }
   0x1   :  { %v23_v0 = vld [vmem:[%s250_s0] sm:$0xff]  ;;  %167 = vmatprep.subr.bf16.mxu0 %v178_v10  ;;  %v59_v12 = vld [vmem:[%s252_s4 + $0x8] sm:$0xff]  ;;  %v60_v13 = vld [vmem:[%s252_s4 + $0x10] sm:$0xff]  ;;  %164 = vmatprep.mubr.msk.f32.mxu0 %vm179_vm1, %v180_v14 }
   0x2   :  { %v24_v1 = vld [vmem:[%s251_s1] sm:$0xff]  ;;  %v61_v16 = vld [vmem:[%s252_s4 + $0x18] sm:$0xff] }
   0x3   :  { %v25_v2 = vadd.f32 %v24_v1, %v23_v0  ;;  %v58_v11 = vld [vmem:[%s252_s4] sm:$0xff]  ;;  %v171_v17 = vpack.c.bf16 %v61_v16, %v60_v13 }
   0x4   :  { %v168_v15 = vpack.c.bf16 %v59_v12, %v58_v11  ;;  %v147_v22 = vld [vmem:[%s253_s2] ss:$0 sm:$0xff] }
   0x5   :  { %v26_v3 = vmul.f32 0.5, %v25_v2  ;;  %v148_v24 = vld [vmem:[%s254_s3] ss:$0 sm:$0xff] }
   0x6   :  { %169 = vmatpush3.bf16.msra.mxu0 %v168_v15  ;;  %v149_v27 = vld [vmem:[%s255_s5] ss:$0 sm:$0xff] }
   0x7   :  { %v30_v4 = vsel %vm29_vm0, %v26_v3, 0.0  ;;  %170 = vmatprep.subr.bf16.mxu0 %v178_v10 }
   0x8   :  { %31 = vadd.xlane.f32.xlu0 %v30_v4 }
   0xa   :  { %172 = vmatpush3.bf16.msra.mxu0 %v171_v17 }
  0x95   :  { %v32_v5 = vpop.xlane.xlu0 %31 }
  0x96   :  { %v34_v6 = vmul.f32 0.03125, %v32_v5 }
  0x98   :  { %v35_v7 = vsub.f32 %v26_v3, %v34_v6 }
  0x9a   :  { %v36_v8 = vmul.f32 %v35_v7, %v35_v7 }
  0x9c   :  { %v37_v9 = vsel %vm29_vm0, %v36_v8, 0.0 }
  0x9d   :  { %38 = vadd.xlane.f32.xlu0 %v37_v9 }
 0x12a   :  { %v39_v18 = vpop.xlane.xlu0 %38 }
 0x12b   :  { %v40_v19 = vmul.f32 0.03125, %v39_v18 }
 0x12d   :  { %v41_v20 = vadd.f32 1e-05, %v40_v19 }
 0x12f   :  { %176 = vrsqrt.f32 %v41_v20 }
 0x139   :  { %v177_v21 = vpop.eup %176 }
 0x13a   :  { %v43_v23 = vmul.f32 %v177_v21, %v35_v7 }
 0x13c   :  { %v50_v25 = vmul.f32 %v147_v22, %v43_v23 }
 0x13e   :  { %v57_v26 = vadd.f32 %v148_v24, %v50_v25 }
 0x140   :  { %165 = vmatmul.mubr.msk.f32.vlgmr.msra.gmra.mrb[0].mxu0 %vm29_vm0, %v57_v26 }
 0x213   :  { %v138_v28 = vpop.f32.mrb[0].mxu0 }
 0x214   :  { %v139_v29 = vadd.f32 %v149_v27, %v138_v28  ;;  %v166_v30 = vpop.f32.mrb[1].mxu0 }
 0x216   :  { %142 = vst.msk [vmem:[%s256_s6] sm:$0xff] %vm29_vm0, %v139_v29 }

// kernel: forward.10
= control target key start
LH: loop header
LB: loop body
LE: loop exit
PB: predicated region body
PF: predicated region fallthrough
CT: control target
= control target key end

     0   :  { %vm48_vm0 = vcmask 261120   ;;  %vm192_vm1 = vcmask 64512   ;;  %s1764_s24 = smov 120   ;;  %vm278_vm3 = vcmask 130048   ;;  %s1766_s25 = smov 64   ;;  %vm1016_vm4 = vcmask 195584   ;;  %s2070_s0 = inlined_call_operand.vmem [shape: f32[16,32], index: 0, kind: input, shape index: {}]   ;;  %s2071_s3 = inlined_call_operand.vmem [shape: f32[32,96], index: 3, kind: input, shape index: {}]   ;;  %s2072_s1 = inlined_call_operand.vmem [shape: f32[1,32], index: 1, kind: input, shape index: {}]   ;;  %s2073_s2 = inlined_call_operand.vmem [shape: f32[1,32], index: 2, kind: input, shape index: {}]   ;;  %s2074_s4 = inlined_call_operand.vmem [shape: f32[1,96], index: 4, kind: input, shape index: {}]   ;;  %s2075_s5 = inlined_call_operand.vmem [shape: f32[32,32], index: 5, kind: input, shape index: {}]   ;;  %s2076_s6 = inlined_call_operand.vmem [shape: f32[1,32], index: 6, kind: input, shape index: {}]   ;;  %s2077_s9 = inlined_call_operand.vmem [shape: f32[32,64], index: 9, kind: input, shape index: {}]   ;;  %s2078_s7 = inlined_call_operand.vmem [shape: f32[1,32], index: 7, kind: input, shape index: {}]   ;;  %s2079_s8 = inlined_call_operand.vmem [shape: f32[1,32], index: 8, kind: input, shape index: {}]   ;;  %s2080_s11 = inlined_call_operand.vmem [shape: f32[64,32], index: 11, kind: input, shape index: {}]   ;;  %s2081_s10 = inlined_call_operand.vmem [shape: f32[1,64], index: 10, kind: input, shape index: {}]   ;;  %s2082_s12 = inlined_call_operand.vmem [shape: f32[1,32], index: 12, kind: input, shape index: {}]   ;;  %s2083_s13 = inlined_call_operand.vmem [shape: f32[16,32], index: 13, kind: output, shape index: {}]  }
   0x1   :  { %v1849_v0 = vld [vmem:[%s2070_s0] sm:$0xff]  ;;  %v1854_v1 = vld [vmem:[%s2070_s0 + $0x8] sm:$0xff]  ;;  %v94_v16 = vld [vmem:[%s2071_s3 + $0x10] sm:$0xff]  ;;  %s1767_s26 = smov 80   ;;  %s1768_s27 = smov 112   ;;  %vm1277_vm5 = vcmask 523264  }
   0x2   :  { %v49_v2 = vsel %vm48_vm0, %v1849_v0, 0.0  ;;  %v52_v3 = vsel %vm48_vm0, %v1854_v1, 0.0  ;;  %v92_v14 = vld [vmem:[%s2071_s3] sm:$0xff]  ;;  %v93_v15 = vld [vmem:[%s2071_s3 + $0x8] sm:$0xff]  ;;  %v95_v18 = vld [vmem:[%s2071_s3 + $0x18] sm:$0xff]  ;;  %s1769_s28 = smov 48  }
   0x3   :  { %50 = vadd.xlane.f32.xlu0 %v49_v2  ;;  %v1584_v17 = vpack.c.bf16 %v93_v15, %v92_v14  ;;  %v1588_v19 = vpack.c.bf16 %v95_v18, %v94_v16  ;;  %v1376_v27 = vld [vmem:[%s2072_s1] ss:$0 sm:$0xff]  ;;  %s1762_s1 = smov 88   ;;  %vm1901_vm2 = vmpackc.low %vm192_vm1, %vm192_vm1  ;;  %s1770_s0 = smov 104  }
   0x4   :  { %v1377_v29 = vld [vmem:[%s2073_s2] ss:$0 sm:$0xff]  ;;  %s1763_s2 = smov 96   ;;  %s1771_s29 = smov 72  }
   0x5   :  { %1585 = vmatprep.subr.bf16.mxu1 %v1584_v17  ;;  %v1378_v36 = vld [vmem:[%s2074_s4] ss:$0 sm:$0xff]  ;;  %s1765_s4 = smov 56   ;;  %s1772_s30 = smov 40  }
   0x6   :  { %1587 = vmatpush3.bf16.msra.mxu1 %v1584_v17  ;;  %s1773_s14 = smov 8   ;;  %s1774_s15 = smov 16  }
   0x7   :  { %53 = vadd.xlane.f32.xlu0 %v52_v3  ;;  %1589 = vmatprep.subr.bf16.mxu1 %v1588_v19  ;;  %s1775_s23 = smov 24  }
   0xa   :  { %1591 = vmatpush3.bf16.msra.mxu1 %v1588_v19 }
  0x90   :  { %v51_v4 = vpop.xlane.xlu0 %50 }
  0x91   :  { %v56_v5 = vmul.f32 0.03125, %v51_v4 }
  0x93   :  { %v58_v6 = vsub.f32 %v1849_v0, %v56_v5 }
  0x94   :  { %v54_v7 = vpop.xlane.xlu0 %53 }
  0x95   :  { %v57_v8 = vmul.f32 0.03125, %v54_v7  ;;  %v60_v9 = vmul.f32 %v58_v6, %v58_v6 }
  0x97   :  { %v59_v10 = vsub.f32 %v1854_v1, %v57_v8  ;;  %v62_v11 = vsel %vm48_vm0, %v60_v9, 0.0 }
  0x98   :  { %63 = vadd.xlane.f32.xlu1 %v62_v11 }
  0x99   :  { %v61_v12 = vmul.f32 %v59_v10, %v59_v10 }
  0x9b   :  { %v65_v13 = vsel %vm48_vm0, %v61_v12, 0.0 }
  0x9c   :  { %66 = vadd.xlane.f32.xlu1 %v65_v13 }
 0x125   :  { %v64_v20 = vpop.xlane.xlu1 %63 }
 0x126   :  { %v68_v21 = vmul.f32 0.03125, %v64_v20 }
 0x128   :  { %v70_v22 = vadd.f32 1e-05, %v68_v21 }
 0x129   :  { %v67_v23 = vpop.xlane.xlu1 %66 }
 0x12a   :  { %1718 = vrsqrt.f32 %v70_v22  ;;  %v69_v24 = vmul.f32 0.03125, %v67_v23 }
 0x12c   :  { %v71_v25 = vadd.f32 1e-05, %v69_v24 }
 0x12e   :  { %1720 = vrsqrt.f32 %v71_v25 }
 0x134   :  { %v1719_v26 = vpop.eup %1718 }
 0x135   :  { %v74_v28 = vmul.f32 %v1719_v26, %v58_v6 }
 0x137   :  { %v82_v30 = vmul.f32 %v1376_v27, %v74_v28 }
 0x138   :  { %v1721_v31 = vpop.eup %1720 }
 0x139   :  { %v75_v32 = vmul.f32 %v1721_v31, %v59_v10  ;;  %v90_v33 = vadd.f32 %v1377_v29, %v82_v30 }
 0x13b   :  { %v83_v34 = vmul.f32 %v1376_v27, %v75_v32  ;;  %1484 = vmatprep.mubr.msk.f32.mxu1 %vm48_vm0, %v90_v33 }
 0x13d   :  { %v91_v35 = vadd.f32 %v1377_v29, %v83_v34 }
 0x13f   :  { %1485 = vmatmul.mubr.msk.f32.vlgmr.msra.gmra.mrb[0].mxu1 %vm48_vm0, %v91_v35 }
 0x212   :  { %v1486_v37 = vpop.f32.mrb[0].mxu1 }
 0x213   :  { %v181_v38 = vadd.f32 %v1486_v37, %v1378_v36  ;;  %v175_v39 = vpop.f32.mrb[1].mxu1 }
 0x214   :  { %v176_v40 = vadd.f32 %v1378_v36, %v175_v39 }
 0x215   :  { %v1896_v43 = vmul.f32 0.35355338, %v181_v38 }
 0x216   :  { %v1887_v41 = vpack.i.bf16 %v181_v38, %v176_v40  ;;  %v1889_v42 = vmul.f32 0.35355338, %v176_v40 }
 0x218   :  { %1684 = vrot.lane.b32.xlu1 %v1887_v41, %s1762_s1  ;;  %1679 = vrot.lane.b32.xlu0 %v1887_v41, %s1763_s2 }
 0x219   :  { %1491 = vmatprep.mubr.msk.f32.mxu1 %vm192_vm1, %v1889_v42 }
 0x21c   :  { %388 = vrot.lane.b32.xlu1 %v1889_v42, %s1764_s24 }
 0x220   :  { %390 = vrot.lane.b32.xlu1 %v1896_v43, %s1764_s24 }
 0x28a   :  { %v1685_v44 = vpop.permute.xlu1 %1684  ;;  %v1680_v45 = vpop.permute.xlu0 %1679 }
 0x28b   :  { %v1687_v46 = vunpack.i.h.bf16 %v1685_v44  ;;  %v1686_v47 = vunpack.i.l.bf16 %v1685_v44  ;;  %v1682_v48 = vunpack.i.h.bf16 %v1680_v45  ;;  %v1681_v49 = vunpack.i.l.bf16 %v1680_v45 }
 0x28d   :  { %v1592_v51 = vpack.c.bf16 %v1682_v48, %v1681_v49  ;;  %v1602_v52 = vpack.c.bf16 %v1687_v46, %v1686_v47 }
 0x28e   :  { %v389_v53 = vpop.permute.xlu1 %388 }
 0x28f   :  { %1594 = vmatprep.subr.msk.bf16.mxu1 %vm1901_vm2, %v1592_v51 }
 0x290   :  { %1597 = vmatpush3.bf16.xpose.msk.msra.mxu1 %vm1901_vm2, %v1592_v51 }
 0x291   :  { %1604 = vmatprep.subr.msk.bf16.mxu1 %vm1901_vm2, %v1602_v52 }
 0x292   :  { %v391_v54 = vpop.permute.xlu1 %390 }
 0x297   :  { %1492 = vmatmul.mubr.msk.f32.vlgmr.msra.gmra.mrb[2].mxu1 %vm192_vm1, %v1896_v43 }
 0x298   :  { %1607 = vmatpush3.bf16.xpose.msk.msra.mxu1 %vm1901_vm2, %v1602_v52  ;;  %1505 = vmatprep.mubr.msk.f32.mxu1 %vm192_vm1, %v389_v53 }
 0x29f   :  { %1506 = vmatmul.mubr.msk.f32.vlgmr.msra.gmra.mrb[4].mxu1 %vm192_vm1, %v391_v54 }
 0x36a   :  { %v1493_v55 = vpop.f32.mrb[2].mxu1 }
 0x36b   :  { %v269_v56 = vpop.f32.mrb[3].mxu1  ;;  %v282_v57 = vsel %vm278_vm3, %v1493_v55, -inf }
 0x36c   :  { %283 = vmax.xlane.f32.xlu1 %v282_v57  ;;  %v279_v58 = vsel %vm278_vm3, %v269_v56, -inf }
 0x36d   :  { %280 = vmax.xlane.f32.xlu0 %v279_v58 }
 0x372   :  { %v1507_v59 = vpop.f32.mrb[4].mxu1 }
 0x373   :  { %v470_v60 = vpop.f32.mrb[5].mxu1  ;;  %v482_v62 = vsel %vm278_vm3, %v1507_v59, -inf }
 0x374   :  { %v479_v61 = vsel %vm278_vm3, %v470_v60, -inf }
 0x375   :  { %480 = vmax.xlane.f32.xlu0 %v479_v61 }
 0x379   :  { %483 = vmax.xlane.f32.xlu0 %v482_v62 }
 0x3f9   :  { %v284_v63 = vpop.xlane.xlu1 %283 }
 0x3fa   :  { %v286_v2 = vsub.f32 %v1493_v55, %v284_v63  ;;  %v281_v3 = vpop.xlane.xlu0 %280 }
 0x3fb   :  { %v285_v4 = vsub.f32 %v269_v56, %v281_v3 }
 0x3fc   :  { %v289_v5 = vmul.f32 1.442695, %v286_v2 }
 0x3fd   :  { %v287_v6 = vmul.f32 1.442695, %v285_v4 }
 0x3fe   :  { %1722 = vpow2.f32 %v289_v5 }
 0x3ff   :  { %1724 = vpow2.f32 %v287_v6 }
 0x402   :  { %v481_v7 = vpop.xlane.xlu0 %480 }
 0x403   :  { %v485_v8 = vsub.f32 %v470_v60, %v481_v7 }
 0x405   :  { %v487_v9 = vmul.f32 1.442695, %v485_v8 }
 0x406   :  { %v484_v10 = vpop.xlane.xlu0 %483 }
 0x407   :  { %1726 = vpow2.f32 %v487_v9  ;;  %v486_v11 = vsub.f32 %v1507_v59, %v484_v10 }
 0x408   :  { %v1723_v12 = vpop.eup %1722 }
 0x409   :  { %v1725_v13 = vpop.eup %1724  ;;  %v489_v14 = vmul.f32 1.442695, %v486_v11  ;;  %v294_v15 = vsel %vm278_vm3, %v1723_v12, 0.0 }
 0x40a   :  { %295 = vadd.xlane.f32.xlu1 %v294_v15  ;;  %v291_v16 = vsel %vm278_vm3, %v1725_v13, 0.0 }
 0x40b   :  { %1728 = vpow2.f32 %v489_v14  ;;  %292 = vadd.xlane.f32.xlu0 %v291_v16 }
 0x411   :  { %v1727_v17 = vpop.eup %1726 }
 0x412   :  { %v491_v18 = vsel %vm278_vm3, %v1727_v17, 0.0 }
 0x413   :  { %492 = vadd.xlane.f32.xlu0 %v491_v18 }
 0x415   :  { %v1729_v19 = vpop.eup %1728 }
 0x416   :  { %v494_v20 = vsel %vm278_vm3, %v1729_v19, 0.0 }
 0x417   :  { %495 = vadd.xlane.f32.xlu1 %v494_v20 }
 0x428   :  { %1694 = vrot.lane.b32.xlu1 %v1887_v41, %s1765_s4 }
 0x429   :  { %1689 = vrot.lane.b32.xlu0 %v1887_v41, %s1766_s25 }
 0x42c   :  { %1699 = vrot.lane.b32.xlu1 %v1887_v41, %s1767_s26 }
 0x42d   :  { %590 = vrot.lane.b32.xlu0 %v1896_v43, %s1768_s27 }
 0x430   :  { %588 = vrot.lane.b32.xlu1 %v1889_v42, %s1768_s27 }
 0x497   :  { %v296_v22 = vpop.xlane.xlu1 %295 }
 0x498   :  { %v293_v21 = vpop.xlane.xlu0 %292 }
 0x499   :  { %1730 = vrcp.f32 %v293_v21 }
 0x49a   :  { %1732 = vrcp.f32 %v296_v22 }
 0x4a0   :  { %v493_v23 = vpop.xlane.xlu0 %492 }
 0x4a1   :  { %1734 = vrcp.f32 %v493_v23 }
 0x4a3   :  { %v1731_v24 = vpop.eup %1730 }
 0x4a4   :  { %v496_v25 = vpop.xlane.xlu1 %495  ;;  %v1690_v26 = vpop.permute.xlu0 %1689  ;;  %v299_v27 = vmul.f32 %v1731_v24, %v1725_v13 }
 0x4a5   :  { %1736 = vrcp.f32 %v496_v25  ;;  %v1692_v28 = vunpack.i.h.bf16 %v1690_v26  ;;  %v1691_v29 = vunpack.i.l.bf16 %v1690_v26  ;;  %v1733_v31 = vpop.eup %1732 }
 0x4a6   :  { %1498 = vmatprep.mubr.msk.f32.mxu0 %vm278_vm3, %v299_v27  ;;  %v300_v37 = vmul.f32 %v1733_v31, %v1723_v12 }
 0x4a7   :  { %v1598_v30 = vpack.c.bf16 %v1692_v28, %v1691_v29 }
 0x4a8   :  { %v1695_v32 = vpop.permute.xlu1 %1694  ;;  %v591_v49 = vpop.permute.xlu0 %590 }
 0x4a9   :  { %v1697_v33 = vunpack.i.h.bf16 %v1695_v32  ;;  %v1696_v34 = vunpack.i.l.bf16 %v1695_v32  ;;  %1599 = vmatprep.subr.bf16.mxu0 %v1598_v30 }
 0x4aa   :  { %1601 = vmatpush3.bf16.msra.mxu0 %v1598_v30 }
 0x4ab   :  { %v1735_v35 = vpop.eup %1734  ;;  %v1608_v36 = vpack.c.bf16 %v1697_v33, %v1696_v34 }
 0x4ac   :  { %v1700_v38 = vpop.permute.xlu1 %1699  ;;  %v499_v39 = vmul.f32 %v1735_v35, %v1727_v17 }
 0x4ad   :  { %v1702_v40 = vunpack.i.h.bf16 %v1700_v38  ;;  %v1701_v44 = vunpack.i.l.bf16 %v1700_v38  ;;  %1499 = vmatmul.mubr.msk.f32.vlgmr.msra.gmra.mrb[0].mxu0 %vm278_vm3, %v300_v37  ;;  %1609 = vmatprep.subr.bf16.mxu0 %v1608_v36 }
 0x4ae   :  { %1611 = vmatpush3.bf16.msra.mxu0 %v1608_v36  ;;  %1512 = vmatprep.mubr.msk.f32.mxu0 %vm278_vm3, %v499_v39 }
 0x4af   :  { %v1737_v45 = vpop.eup %1736  ;;  %v1612_v46 = vpack.c.bf16 %v1702_v40, %v1701_v44 }
 0x4b0   :  { %v500_v47 = vmul.f32 %v1737_v45, %v1729_v19  ;;  %v589_v48 = vpop.permute.xlu1 %588 }
 0x4b1   :  { %1614 = vmatprep.subr.msk.bf16.mxu0 %vm1901_vm2, %v1612_v46 }
 0x4b2   :  { %1513 = vmatmul.mubr.msk.f32.vlgmr.msra.gmra.mrb[2].mxu0 %vm278_vm3, %v500_v47 }
 0x4b3   :  { %1519 = vmatprep.mubr.msk.f32.mxu0 %vm192_vm1, %v589_v48  ;;  %v1019_v48 = vld [vmem:[%s2075_s5] sm:$0xff] }
 0x4b7   :  { %1617 = vmatpush3.bf16.xpose.msk.msra.mxu0 %vm1901_vm2, %v1612_v46 }
 0x4be   :  { %1520 = vmatmul.mubr.msk.f32.vlgmr.msra.gmra.mrb[4].mxu0 %vm192_vm1, %v591_v49  ;;  %v1020_v49 = vld [vmem:[%s2075_s5 + $0x8] sm:$0xff] }
 0x580   :  { %v1940_v51 = vpop.f32.mrb[0].mxu0 }
 0x581   :  { %v1942_v52 = vpop.f32.mrb[1].mxu0 }
 0x585   :  { %v1944_v53 = vpop.f32.mrb[2].mxu0 }
 0x586   :  { %v1946_v54 = vpop.f32.mrb[3].mxu0 }
 0x591   :  { %v1521_v55 = vpop.f32.mrb[4].mxu0 }
 0x592   :  { %v670_v56 = vpop.f32.mrb[5].mxu0  ;;  %v682_v57 = vsel %vm278_vm3, %v1521_v55, -inf }
 0x593   :  { %683 = vmax.xlane.f32.xlu0 %v682_v57  ;;  %v679_v58 = vsel %vm278_vm3, %v670_v56, -inf }
 0x594   :  { %680 = vmax.xlane.f32.xlu1 %v679_v58 }
 0x5a5   :  { %1704 = vrot.lane.b32.xlu1 %v1887_v41, %s1769_s28 }
 0x5a9   :  { %788 = vrot.lane.b32.xlu1 %v1889_v42, %s1770_s0 }
 0x5ad   :  { %790 = vrot.lane.b32.xlu1 %v1896_v43, %s1770_s0 }
 0x620   :  { %v684_v59 = vpop.xlane.xlu0 %683 }
 0x621   :  { %v686_v60 = vsub.f32 %v1521_v55, %v684_v59  ;;  %v681_v61 = vpop.xlane.xlu1 %680  ;;  %v1022_v55 = vld [vmem:[%s2075_s5 + $0x18] sm:$0xff] }
 0x622   :  { %v685_v62 = vsub.f32 %v670_v56, %v681_v61 }
 0x623   :  { %v689_v63 = vmul.f32 1.442695, %v686_v60 }
 0x624   :  { %v687_v2 = vmul.f32 1.442695, %v685_v62 }
 0x625   :  { %1738 = vpow2.f32 %v689_v63  ;;  %v1705_v3 = vpop.permute.xlu1 %1704 }
 0x626   :  { %v1707_v4 = vunpack.i.h.bf16 %v1705_v3  ;;  %v1706_v5 = vunpack.i.l.bf16 %v1705_v3  ;;  %1740 = vpow2.f32 %v687_v2 }
 0x628   :  { %v1618_v6 = vpack.c.bf16 %v1707_v4, %v1706_v5 }
 0x629   :  { %v789_v19 = vpop.permute.xlu1 %788 }
 0x62a   :  { %1619 = vmatprep.subr.bf16.mxu1 %v1618_v6 }
 0x62b   :  { %1621 = vmatpush3.bf16.msra.mxu1 %v1618_v6 }
 0x62d   :  { %v791_v20 = vpop.permute.xlu1 %790 }
 0x62f   :  { %v1739_v7 = vpop.eup %1738 }
 0x630   :  { %v694_v8 = vsel %vm278_vm3, %v1739_v7, 0.0  ;;  %v1741_v42 = vpop.eup %1740 }
 0x631   :  { %695 = vadd.xlane.f32.xlu0 %v694_v8  ;;  %v691_v43 = vsel %vm278_vm3, %v1741_v42, 0.0 }
 0x635   :  { %692 = vadd.xlane.f32.xlu0 %v691_v43 }
 0x64b   :  { %1709 = vrot.lane.b32.xlu0 %v1887_v41, %s1771_s29 }
 0x6be   :  { %v696_v9 = vpop.xlane.xlu0 %695 }
 0x6bf   :  { %1742 = vrcp.f32 %v696_v9 }
 0x6c2   :  { %v693_v10 = vpop.xlane.xlu0 %692 }
 0x6c3   :  { %1744 = vrcp.f32 %v693_v10 }
 0x6c6   :  { %v1710_v11 = vpop.permute.xlu0 %1709 }
 0x6c7   :  { %v1712_v12 = vunpack.i.h.bf16 %v1710_v11  ;;  %v1711_v13 = vunpack.i.l.bf16 %v1710_v11 }
 0x6c9   :  { %v1622_v14 = vpack.c.bf16 %v1712_v12, %v1711_v13  ;;  %v1743_v15 = vpop.eup %1742 }
 0x6ca   :  { %v700_v18 = vmul.f32 %v1743_v15, %v1739_v7 }
 0x6cb   :  { %1624 = vmatprep.subr.msk.bf16.mxu1 %vm1901_vm2, %v1622_v14 }
 0x6cd   :  { %v1745_v16 = vpop.eup %1744 }
 0x6ce   :  { %v699_v17 = vmul.f32 %v1745_v16, %v1741_v42 }
 0x6d0   :  { %1526 = vmatprep.mubr.msk.f32.mxu1 %vm278_vm3, %v699_v17 }
 0x6d1   :  { %1527 = vmatmul.mubr.msk.f32.vlgmr.msra.gmra.mrb[6].mxu1 %vm278_vm3, %v700_v18 }
 0x6d2   :  { %1627 = vmatpush3.bf16.xpose.msk.msra.mxu1 %vm1901_vm2, %v1622_v14  ;;  %1533 = vmatprep.mubr.msk.f32.mxu1 %vm192_vm1, %v789_v19 }
 0x6d9   :  { %1534 = vmatmul.mubr.msk.f32.vlgmr.msra.gmra.mrb[8].mxu1 %vm192_vm1, %v791_v20 }
 0x7a4   :  { %v1528_v21 = vpop.f32.mrb[6].mxu1 }
 0x7a5   :  { %v779_v22 = vpop.f32.mrb[7].mxu1 }
 0x7ac   :  { %v1535_v23 = vpop.f32.mrb[8].mxu1 }
 0x7ad   :  { %v870_v24 = vpop.f32.mrb[9].mxu1  ;;  %v882_v25 = vsel %vm278_vm3, %v1535_v23, -inf }
 0x7ae   :  { %883 = vmax.xlane.f32.xlu0 %v882_v25  ;;  %v879_v26 = vsel %vm278_vm3, %v870_v24, -inf  ;;  %v1161_v25 = vld [vmem:[%s2077_s9 + $0x10] sm:$0xff] }
 0x7af   :  { %880 = vmax.xlane.f32.xlu1 %v879_v26  ;;  %v1162_v26 = vld [vmem:[%s2077_s9 + $0x18] sm:$0xff] }
 0x7c0   :  { %1714 = vrot.lane.b32.xlu1 %v1887_v41, %s1772_s30 }
 0x7c4   :  { %992 = vrot.lane.b32.xlu1 %v1944_v53, %s1773_s14  ;;  %v1021_v53 = vld [vmem:[%s2075_s5 + $0x10] sm:$0xff] }
 0x7c5   :  { %v1636_v56 = vpack.c.bf16 %v1022_v55, %v1021_v53  ;;  %v1274_v55 = vld [vmem:[%s2080_s11 + $0x28] sm:$0xff] }
 0x7c8   :  { %998 = vrot.lane.b32.xlu1 %v779_v22, %s1774_s15  ;;  %v1159_v22 = vld [vmem:[%s2077_s9] sm:$0xff] }
 0x7cc   :  { %1000 = vrot.lane.b32.xlu1 %v1528_v21, %s1774_s15 }
 0x83b   :  { %v884_v50 = vpop.xlane.xlu0 %883 }
 0x83c   :  { %v886_v27 = vsub.f32 %v1535_v23, %v884_v50  ;;  %v881_v28 = vpop.xlane.xlu1 %880  ;;  %v1160_v23 = vld [vmem:[%s2077_s9 + $0x8] sm:$0xff]  ;;  %v1644_v50 = vpack.c.bf16 %v1162_v26, %v1161_v25 }
 0x83d   :  { %v885_v29 = vsub.f32 %v870_v24, %v881_v28  ;;  %v1640_v24 = vpack.c.bf16 %v1160_v23, %v1159_v22 }
 0x83e   :  { %v889_v30 = vmul.f32 1.442695, %v886_v27 }
 0x83f   :  { %v887_v31 = vmul.f32 1.442695, %v885_v29  ;;  %1641 = vmatprep.subr.bf16.mxu1 %v1640_v24 }
 0x840   :  { %v1715_v32 = vpop.permute.xlu1 %1714  ;;  %1643 = vmatpush3.bf16.msra.mxu1 %v1640_v24 }
 0x841   :  { %1746 = vpow2.f32 %v887_v31  ;;  %v1717_v33 = vunpack.i.h.bf16 %v1715_v32  ;;  %v1716_v34 = vunpack.i.l.bf16 %v1715_v32  ;;  %1645 = vmatprep.subr.bf16.mxu1 %v1644_v50 }
 0x842   :  { %1748 = vpow2.f32 %v889_v30 }
 0x843   :  { %v1628_v35 = vpack.c.bf16 %v1717_v33, %v1716_v34  ;;  %v1408_v34 = vld [vmem:[%s2078_s7] ss:$0 sm:$0xff] }
 0x844   :  { %v993_v59 = vpop.permute.xlu1 %992  ;;  %1647 = vmatpush3.bf16.msra.mxu1 %v1644_v50 }
 0x845   :  { %1629 = vmatprep.subr.bf16.mxu0 %v1628_v35  ;;  %v1013_v3 = vsel %vm192_vm1, %v1940_v51, %v993_v59 }
 0x846   :  { %1631 = vmatpush3.bf16.msra.mxu0 %v1628_v35 }
 0x848   :  { %v999_v60 = vpop.permute.xlu1 %998 }
 0x84b   :  { %v1747_v41 = vpop.eup %1746 }
 0x84c   :  { %v891_v36 = vsel %vm278_vm3, %v1747_v41, 0.0  ;;  %v1749_v37 = vpop.eup %1748  ;;  %v1001_v62 = vpop.permute.xlu1 %1000 }
 0x84d   :  { %892 = vadd.xlane.f32.xlu0 %v891_v36  ;;  %v894_v38 = vsel %vm278_vm3, %v1749_v37, 0.0  ;;  %v1015_v6 = vsel %vm278_vm3, %v1013_v3, %v1001_v62 }
 0x851   :  { %895 = vadd.xlane.f32.xlu0 %v894_v38 }
 0x867   :  { %990 = vrot.lane.b32.xlu0 %v1946_v54, %s1773_s14  ;;  %v1632_v54 = vpack.c.bf16 %v1020_v49, %v1019_v48  ;;  %v1271_v48 = vld [vmem:[%s2080_s11 + $0x10] sm:$0xff]  ;;  %v1272_v49 = vld [vmem:[%s2080_s11 + $0x18] sm:$0xff] }
 0x868   :  { %v1652_v53 = vpack.c.bf16 %v1272_v49, %v1271_v48 }
 0x869   :  { %1633 = vmatprep.subr.bf16.mxu0 %v1632_v54 }
 0x8da   :  { %v893_v39 = vpop.xlane.xlu0 %892 }
 0x8db   :  { %1750 = vrcp.f32 %v893_v39 }
 0x8de   :  { %v896_v40 = vpop.xlane.xlu0 %895 }
 0x8df   :  { %1752 = vrcp.f32 %v896_v40 }
 0x8e2   :  { %v991_v61 = vpop.permute.xlu0 %990 }
 0x8e3   :  { %v1012_v63 = vsel %vm192_vm1, %v1942_v52, %v991_v61  ;;  %v1407_v52 = vld [vmem:[%s2076_s6] ss:$0 sm:$0xff] }
 0x8e4   :  { %v1014_v4 = vsel %vm278_vm3, %v1012_v63, %v999_v60  ;;  %v1410_v60 = vld [vmem:[%s2081_s10] ss:$0 sm:$0xff] }
 0x8e5   :  { %v1751_v44 = vpop.eup %1750 }
 0x8e6   :  { %v899_v45 = vmul.f32 %v1751_v44, %v1747_v41  ;;  %v1409_v41 = vld [vmem:[%s2079_s8] ss:$0 sm:$0xff] }
 0x8e8   :  { %1540 = vmatprep.mubr.msk.f32.mxu0 %vm278_vm3, %v899_v45  ;;  %v1269_v45 = vld [vmem:[%s2080_s11] sm:$0xff] }
 0x8e9   :  { %v1753_v46 = vpop.eup %1752 }
 0x8ea   :  { %v900_v47 = vmul.f32 %v1753_v46, %v1749_v37  ;;  %v1270_v46 = vld [vmem:[%s2080_s11 + $0x8] sm:$0xff] }
 0x8ec   :  { %1541 = vmatmul.mubr.msk.f32.vlgmr.msra.gmra.mrb[6].mxu0 %vm278_vm3, %v900_v47  ;;  %v1648_v47 = vpack.c.bf16 %v1270_v46, %v1269_v45 }
 0x8ed   :  { %1635 = vmatpush3.bf16.msra.mxu0 %v1632_v54  ;;  %v1273_v54 = vld [vmem:[%s2080_s11 + $0x20] sm:$0xff] }
 0x8ee   :  { %1637 = vmatprep.subr.bf16.mxu0 %v1636_v56 }
 0x8f1   :  { %1639 = vmatpush3.bf16.msra.mxu0 %v1636_v56  ;;  %v1656_v56 = vpack.c.bf16 %v1274_v55, %v1273_v54 }
 0x8f2   :  { %1649 = vmatprep.subr.bf16.mxu0 %v1648_v47 }
 0x9bf   :  { %v1542_v57 = vpop.f32.mrb[6].mxu0 }
 0x9c0   :  { %1008 = vrot.lane.b32.xlu1 %v1542_v57, %s1775_s23  ;;  %v979_v58 = vpop.f32.mrb[7].mxu0  ;;  %v1275_v57 = vld [vmem:[%s2080_s11 + $0x30] sm:$0xff] }
 0x9c1   :  { %1006 = vrot.lane.b32.xlu0 %v979_v58, %s1775_s23  ;;  %v1276_v58 = vld [vmem:[%s2080_s11 + $0x38] sm:$0xff] }
 0x9c2   :  { %v1660_v59 = vpack.c.bf16 %v1276_v58, %v1275_v57 }
 0xa32   :  { %v1009_v2 = vpop.permute.xlu1 %1008 }
 0xa33   :  { %v1007_v5 = vpop.permute.xlu0 %1006  ;;  %v1018_v8 = vsel %vm1016_vm4, %v1015_v6, %v1009_v2 }
 0xa34   :  { %v1017_v7 = vsel %vm1016_vm4, %v1014_v4, %v1007_v5 }
 0xa35   :  { %1551 = vmatprep.mubr.msk.f32.mxu0 %vm48_vm0, %v1017_v7 }
 0xa36   :  { %1552 = vmatmul.mubr.msk.f32.vlgmr.msra.gmra.mrb[8].mxu0 %vm48_vm0, %v1018_v8 }
 0xa37   :  { %1651 = vmatpush3.bf16.msra.mxu0 %v1648_v47 }
 0xa38   :  { %1653 = vmatprep.subr.bf16.mxu0 %v1652_v53 }
 0xa3b   :  { %1655 = vmatpush3.bf16.msra.mxu0 %v1652_v53 }
 0xa3c   :  { %1657 = vmatprep.subr.bf16.mxu0 %v1656_v56 }
 0xa3f   :  { %1659 = vmatpush3.bf16.msra.mxu0 %v1656_v56 }
 0xa40   :  { %1661 = vmatprep.subr.bf16.mxu0 %v1660_v59 }
 0xa43   :  { %1663 = vmatpush3.bf16.msra.mxu0 %v1660_v59 }
 0xb09   :  { %v1553_v42 = vpop.f32.mrb[8].mxu0 }
 0xb0a   :  { %v1105_v43 = vadd.f32 %v1553_v42, %v1854_v1  ;;  %v1095_v9 = vpop.f32.mrb[9].mxu0 }
 0xb0b   :  { %v1104_v51 = vadd.f32 %v1095_v9, %v1849_v0 }
 0xb0c   :  { %v1998_v10 = vadd.f32 %v1407_v52, %v1105_v43 }
 0xb0d   :  { %v2000_v11 = vadd.f32 %v1407_v52, %v1104_v51 }
 0xb0e   :  { %v1120_v12 = vsel %vm48_vm0, %v1998_v10, 0.0 }
 0xb0f   :  { %1121 = vadd.xlane.f32.xlu1 %v1120_v12  ;;  %v1117_v13 = vsel %vm48_vm0, %v2000_v11, 0.0 }
 0xb10   :  { %1118 = vadd.xlane.f32.xlu0 %v1117_v13 }
 0xb9c   :  { %v1122_v14 = vpop.xlane.xlu1 %1121 }
 0xb9d   :  { %v1124_v15 = vmul.f32 0.03125, %v1122_v14  ;;  %v1119_v16 = vpop.xlane.xlu0 %1118 }
 0xb9e   :  { %v1123_v17 = vmul.f32 0.03125, %v1119_v16 }
 0xb9f   :  { %v1126_v1 = vsub.f32 %v1998_v10, %v1124_v15 }
 0xba0   :  { %v1125_v0 = vsub.f32 %v2000_v11, %v1123_v17 }
 0xba1   :  { %v1128_v20 = vmul.f32 %v1126_v1, %v1126_v1 }
 0xba2   :  { %v1127_v18 = vmul.f32 %v1125_v0, %v1125_v0 }
 0xba3   :  { %v1132_v21 = vsel %vm48_vm0, %v1128_v20, 0.0 }
 0xba4   :  { %v1129_v19 = vsel %vm48_vm0, %v1127_v18, 0.0  ;;  %v1415_v18 = vld [vmem:[%s2082_s12] ss:$0 sm:$0xff] }
 0xba5   :  { %1130 = vadd.xlane.f32.xlu0 %v1129_v19 }
 0xba9   :  { %1133 = vadd.xlane.f32.xlu0 %v1132_v21 }
 0xc32   :  { %v1131_v27 = vpop.xlane.xlu0 %1130 }
 0xc33   :  { %v1135_v28 = vmul.f32 0.03125, %v1131_v27 }
 0xc35   :  { %v1137_v29 = vadd.f32 1e-05, %v1135_v28 }
 0xc36   :  { %v1134_v30 = vpop.xlane.xlu0 %1133 }
 0xc37   :  { %1754 = vrsqrt.f32 %v1137_v29  ;;  %v1136_v31 = vmul.f32 0.03125, %v1134_v30 }
 0xc39   :  { %v1138_v32 = vadd.f32 1e-05, %v1136_v31 }
 0xc3b   :  { %1756 = vrsqrt.f32 %v1138_v32 }
 0xc41   :  { %v1755_v33 = vpop.eup %1754 }
 0xc42   :  { %v1141_v35 = vmul.f32 %v1755_v33, %v1125_v0 }
 0xc44   :  { %v1149_v36 = vmul.f32 %v1408_v34, %v1141_v35 }
 0xc45   :  { %v1757_v37 = vpop.eup %1756 }
 0xc46   :  { %v1142_v38 = vmul.f32 %v1757_v37, %v1126_v1  ;;  %v1157_v39 = vadd.f32 %v1409_v41, %v1149_v36 }
 0xc48   :  { %v1150_v40 = vmul.f32 %v1408_v34, %v1142_v38  ;;  %1562 = vmatprep.mubr.msk.f32.mxu1 %vm48_vm0, %v1157_v39 }
 0xc4a   :  { %v1158_v44 = vadd.f32 %v1409_v41, %v1150_v40 }
 0xc4c   :  { %1563 = vmatmul.mubr.msk.f32.vlgmr.msra.gmra.mrb[10].mxu1 %vm48_vm0, %v1158_v44 }
 0xd1f   :  { %v1564_v61 = vpop.f32.mrb[10].mxu1 }
 0xd20   :  { %v1248_v62 = vadd.f32 %v1564_v61, %v1410_v60  ;;  %v1242_v63 = vpop.f32.mrb[11].mxu1 }
 0xd21   :  { %v1243_v2 = vadd.f32 %v1410_v60, %v1242_v63 }
 0xd22   :  { %v1252_v3 = vmul.f32 %v1248_v62, %v1248_v62 }
 0xd23   :  { %v1251_v4 = vmul.f32 %v1243_v2, %v1243_v2 }
 0xd24   :  { %v1254_v5 = vmul.f32 %v1252_v3, %v1248_v62 }
 0xd25   :  { %v1253_v6 = vmul.f32 %v1251_v4, %v1243_v2 }
 0xd26   :  { %v1256_v7 = vmul.f32 0.044715, %v1254_v5 }
 0xd27   :  { %v1255_v8 = vmul.f32 0.044715, %v1253_v6 }
 0xd28   :  { %v1258_v42 = vadd.f32 %v1256_v7, %v1248_v62 }
 0xd29   :  { %v1257_v52 = vadd.f32 %v1255_v8, %v1243_v2 }
 0xd2a   :  { %v1260_v43 = vmul.f32 0.7978846, %v1258_v42 }
 0xd2b   :  { %v1259_v9 = vmul.f32 0.7978846, %v1257_v52 }
 0xd2c   :  { %1758 = vtanh.f32 %v1260_v43 }
 0xd2d   :  { %1760 = vtanh.f32 %v1259_v9 }
 0xd36   :  { %v1759_v51 = vpop.eup %1758 }
 0xd37   :  { %v1761_v12 = vpop.eup %1760  ;;  %v1264_v13 = vadd.f32 1.0, %v1759_v51 }
 0xd38   :  { %v1263_v14 = vadd.f32 1.0, %v1761_v12 }
 0xd39   :  { %v1266_v15 = vmul.f32 0.5, %v1264_v13 }
 0xd3a   :  { %v1265_v16 = vmul.f32 0.5, %v1263_v14 }
 0xd3b   :  { %v1268_v1 = vmul.f32 %v1266_v15, %v1248_v62 }
 0xd3c   :  { %v1267_v17 = vmul.f32 %v1265_v16, %v1243_v2 }
 0xd3e   :  { %1581 = vmatprep.mubr.msk.f32.mxu0 %vm1277_vm5, %v1267_v17 }
 0xd3f   :  { %1582 = vmatmul.mubr.msk.f32.vlgmr.msra.gmra.mrb[10].mxu0 %vm1277_vm5, %v1268_v1 }
 0xe12   :  { %v1583_v0 = vpop.f32.mrb[10].mxu0 }
 0xe13   :  { %v1360_v19 = vadd.f32 %v1583_v0, %v1998_v10  ;;  %v1350_v20 = vpop.f32.mrb[11].mxu0 }
 0xe14   :  { %v1359_v21 = vadd.f32 %v1350_v20, %v2000_v11 }
 0xe15   :  { %v1369_v22 = vadd.f32 %v1415_v18, %v1360_v19 }
 0xe16   :  { %v1368_v23 = vadd.f32 %v1415_v18, %v1359_v21 }
 0xe17   :  { %1371 = vst.msk [vmem:[%s2083_s13 + $0x8] sm:$0xff] %vm48_vm0, %v1369_v22 }
 0xe18   :  { %1370 = vst.msk [vmem:[%s2083_s13] sm:$0xff] %vm48_vm0, %v1368_v23 }

// kernel: forward.15
= control target key start
LH: loop header
LB: loop body
LE: loop exit
PB: predicated region body
PF: predicated region fallthrough
CT: control target
= control target key end

     0   :  { %10 = vsyncpa [#allocation3], 0  ;;  %vm21_vm0 = vcmask 261120   ;;  %s298_s0 = inlined_call_operand.vmem [shape: f32[8,32], index: 0, kind: input, shape index: {}]   ;;  %s299_s1 = inlined_call_operand.vmem [shape: f32[1,32], index: 1, kind: input, shape index: {}]   ;;  %s300_s2 = inlined_call_operand.vmem [shape: f32[32,128], index: 2, kind: input, shape index: {}]   ;;  %s301_s3 = inlined_call_operand.hbm [shape: f32[8,32], index: 3, kind: output, shape index: {0}]   ;;  %s302_s4 = inlined_call_operand.hbm [shape: f32[8,128], index: 4, kind: output, shape index: {1}]  }
   0x1   :  { %v18_v0 = vld [vmem:[%s298_s0] sm:$0xff] }
   0x2   :  { %11 = vsyncpa [#allocation5], 0  ;;  %v20_v1 = vmul.f32 %v18_v0, %v18_v0  ;;  %v38_v3 = vld [vmem:[%s300_s2] sm:$0xff]  ;;  %v39_v4 = vld [vmem:[%s300_s2 + $0x8] sm:$0xff]  ;;  %v223_v6 = vmov 0.0|0.0   ;;  %vm224_vm1 = vmmov 0  }
   0x3   :  { %v40_v5 = vld [vmem:[%s300_s2 + $0x10] sm:$0xff]  ;;  %162 = vmatprep.subr.bf16.mxu0 %v223_v6  ;;  %v163_v7 = vpack.c.bf16 %v39_v4, %v38_v3  ;;  %v41_v8 = vld [vmem:[%s300_s2 + $0x18] sm:$0xff]  ;;  %v225_v9 = vmov 0.0   ;;  %v144_v15 = vld [vmem:[%s299_s1] ss:$0 sm:$0xff]  ;;  %s226_s2 = smov [#allocation2]  }
   0x4   :  { %v22_v2 = vsel %vm21_vm0, %v20_v1, 0.0  ;;  %159 = vmatprep.mubr.msk.f32.mxu0 %vm224_vm1, %v225_v9  ;;  %v166_v10 = vpack.c.bf16 %v41_v8, %v40_v5  ;;  %s122_s26 = sshll.u32 %s226_s2, 4  ;;  %s123_s26 = int_to_ptr.vmem [resolvable:$true] %s122_s26 }
   0x5   :  { %23 = vadd.xlane.f32.xlu0 %v22_v2  ;;  %164 = vmatpush3.bf16.msra.mxu0 %v163_v7  ;;  %s175_s27 = scalar_lea.vmem %s123_s26, 128  ;;  %p180_p1 = scmp.lt.s32.totalorder %s123_s26, %s123_s26 }
   0x6   :  { %165 = vmatprep.subr.bf16.mxu0 %v223_v6  ;;  %p176_p0 = scmp.ne.s32.totalorder %s123_s26, %s175_s27  ;;  %p181_p2 = scmp.lt.s32.totalorder %s175_s27, %s175_s27 }
   0x8   :  { %p182_p3 = por %p181_p2, %p180_p1 }
   0x9   :  { %167 = vmatpush3.bf16.msra.mxu0 %v166_v10 }
   0xa   :  { %p183_p4 = pnand %p182_p3, %p176_p0 }
  0x92   :  { %v24_v11 = vpop.xlane.xlu0 %23 }
  0x93   :  { %v26_v12 = vmul.f32 0.03125, %v24_v11 }
  0x95   :  { %v27_v13 = vadd.f32 1e-06, %v26_v12 }
  0x97   :  { %173 = vrsqrt.f32 %v27_v13 }
  0xa1   :  { %v174_v14 = vpop.eup %173 }
  0xa2   :  { %v29_v16 = vmul.f32 %v174_v14, %v18_v0 }
  0xa4   :  { %v36_v17 = vmul.f32 %v144_v15, %v29_v16 }
  0xa6   :  { %160 = vmatmul.mubr.msk.f32.vlgmr.msra.gmra.mrb[0].mxu0 %vm21_vm0, %v36_v17  ;;  %37 = vst.msk [vmem:[#allocation2] sm:$0xff] %vm21_vm0, %v36_v17 }
  0xa7   :  { %186 = shalt.err (!%p183_p4)
}
  0xa8   :  { %s187_s1 = scalar_lea.hbm %s301_s3, 128 }
  0xa9   :  { %p188_p5 = scmp.ne.s32.totalorder %s301_s3, %s187_s1  ;;  %p191_p6 = scmp.lt.u32.totalorder %s187_s1, %s301_s3 }
  0xab   :  { %p193_p7 = pnand %p191_p6, %p188_p5 }
  0xad   :  { %196 = shalt.err (!%p193_p7)
}
  0xae   :  { %125 = dma.vmem_to_hbm [thread:$0]  %s123_s26, 128, %s301_s3, [#allocation3]  }
  0xaf   :  { %s227_s10 = smov [#allocation4]  }
  0xb0   :  { %s132_s11 = sshll.u32 %s227_s10, 4  ;;  %s133_s11 = int_to_ptr.vmem [resolvable:$true] %s132_s11 }
  0xb1   :  { %s197_s12 = scalar_lea.vmem %s133_s11, 128  ;;  %p202_p9 = scmp.lt.s32.totalorder %s133_s11, %s133_s11 }
  0xb2   :  { %p198_p8 = scmp.ne.s32.totalorder %s133_s11, %s197_s12  ;;  %p203_p10 = scmp.lt.s32.totalorder %s197_s12, %s197_s12 }
  0xb4   :  { %p204_p11 = por %p203_p10, %p202_p9 }
  0xb6   :  { %p205_p12 = pnand %p204_p11, %p198_p8 }
 0x179   :  { %v111_v18 = vpop.f32.mrb[0].mxu0 }
 0x17a   :  { %115 = vst [vmem:[#allocation4] sm:$0xff] %v111_v18  ;;  %v161_v19 = vpop.f32.mrb[1].mxu0 }
 0x17b   :  { %208 = shalt.err (!%p205_p12)
}
 0x17c   :  { %s209_s15 = scalar_lea.hbm %s302_s4, 128 }
 0x17d   :  { %p210_p13 = scmp.ne.s32.totalorder %s302_s4, %s209_s15  ;;  %p213_p0 = scmp.lt.u32.totalorder %s209_s15, %s302_s4 }
 0x17f   :  { %p215_p1 = pnand %p213_p0, %p210_p13 }
 0x181   :  { %218 = shalt.err (!%p215_p1)
}
 0x182   :  { %135 = dma.vmem_to_hbm [thread:$0]  %s133_s11, 128, %s302_s4, [#allocation5]  }
 0x183   :  { %219 = dma.done.wait [#allocation3], 128  }
 0x184   :  { %220 = vsyncadd [#allocation3], 4294967168 }
 0x185   :  { %221 = dma.done.wait [#allocation5], 128  }
 0x186   :  { %222 = vsyncadd [#allocation5], 4294967168 }
 0x187   :  { %142 = vsyncpa [#allocation3], 1 }
 0x188   :  { %143 = vsyncpa [#allocation5], 1 }

// kernel: forward.13
= control target key start
LH: loop header
LB: loop body
LE: loop exit
PB: predicated region body
PF: predicated region fallthrough
CT: control target
= control target key end

     0   :  { %vm45_vm0 = vcmask 261120   ;;  %v1475_v3 = vmov 0.0|0.0   ;;  %vm1476_vm1 = vmmov 0   ;;  %v1477_v7 = vmov 0.0   ;;  %s1478_s25 = smov 100   ;;  %s1480_s26 = smov 108   ;;  %s1800_s0 = inlined_call_operand.vmem [shape: f32[8,32], index: 0, kind: input, shape index: {}]   ;;  %s1801_s4 = inlined_call_operand.vmem [shape: f32[32,96], index: 4, kind: input, shape index: {}]   ;;  %s1802_s3 = inlined_call_operand.vmem [shape: f32[1,32], index: 3, kind: input, shape index: {}]   ;;  %s1803_s5 = inlined_call_operand.vmem [shape: f32[1,96], index: 5, kind: input, shape index: {}]   ;;  %s1804_s1 = inlined_call_operand.vmem [shape: f32[8,8], index: 1, kind: input, shape index: {}]   ;;  %s1805_s2 = inlined_call_operand.vmem [shape: f32[8,8], index: 2, kind: input, shape index: {}]   ;;  %s1806_s6 = inlined_call_operand.vmem [shape: f32[32,32], index: 6, kind: input, shape index: {}]   ;;  %s1807_s8 = inlined_call_operand.vmem [shape: f32[32,128], index: 8, kind: input, shape index: {}]   ;;  %s1808_s7 = inlined_call_operand.vmem [shape: f32[1,32], index: 7, kind: input, shape index: {}]   ;;  %s1809_s9 = inlined_call_operand.vmem [shape: f32[64,32], index: 9, kind: input, shape index: {}]   ;;  %s1810_s10 = inlined_call_operand.vmem [shape: f32[8,32], index: 10, kind: output, shape index: {}]  }
   0x1   :  { %v1560_v0 = vld [vmem:[%s1800_s0] sm:$0xff]  ;;  %1394 = vmatprep.subr.bf16.mxu1 %v1475_v3  ;;  %v62_v5 = vld [vmem:[%s1801_s4 + $0x8] sm:$0xff]  ;;  %v63_v6 = vld [vmem:[%s1801_s4 + $0x10] sm:$0xff]  ;;  %1310 = vmatprep.mubr.msk.f32.mxu1 %vm1476_vm1, %v1477_v7  ;;  %s1481_s27 = smov 124   ;;  %s1483_s28 = smov 84   ;;  %vm155_vm2 = vcmask 31744  }
   0x2   :  { %v44_v1 = vmul.f32 %v1560_v0, %v1560_v0  ;;  %v61_v4 = vld [vmem:[%s1801_s4] sm:$0xff]  ;;  %v64_v9 = vld [vmem:[%s1801_s4 + $0x18] sm:$0xff]  ;;  %1323 = vmatprep.subr.mxu0 %v1477_v7  ;;  %1325 = vmatprep.mubr.msk.f32.mxu0 %vm1476_vm1, %v1477_v7  ;;  %s1484_s29 = smov 116   ;;  %s1485_s12 = smov 32   ;;  %vm180_vm3 = vcmask 64512   ;;  %vm967_vm5 = vcmask 130048  }
   0x3   :  { %v1395_v8 = vpack.c.bf16 %v62_v5, %v61_v4  ;;  %v1398_v10 = vpack.c.bf16 %v64_v9, %v63_v6  ;;  %v1242_v15 = vld [vmem:[%s1802_s3] ss:$0 sm:$0xff]  ;;  %s1479_s3 = smov 92   ;;  %s1486_s13 = smov 40   ;;  %vm969_vm6 = vcmask 195584   ;;  %vm1162_vm7 = vcmask 523264  }
   0x4   :  { %v46_v2 = vsel %vm45_vm0, %v44_v1, 0.0  ;;  %v1243_v18 = vld [vmem:[%s1803_s5] ss:$0 sm:$0xff]  ;;  %s1482_s5 = smov 68   ;;  %s1487_s14 = smov 8  }
   0x5   :  { %47 = vadd.xlane.f32.xlu0 %v46_v2  ;;  %1396 = vmatpush3.bf16.msra.mxu1 %v1395_v8  ;;  %v1613_v23 = vld [vmem:[%s1804_s1] sm:$0xff]  ;;  %s1488_s15 = smov 76   ;;  %s1489_s1 = smov 16  }
   0x6   :  { %1397 = vmatprep.subr.bf16.mxu1 %v1475_v3  ;;  %s1490_s16 = smov 48   ;;  %s1491_s17 = smov 56   ;;  %v1634_v25 = vld [vmem:[%s1805_s2] sm:$0xff] }
   0x7   :  { %s1492_s2 = smov 24   ;;  %s1493_s19 = smov 4  }
   0x8   :  { %s1494_s20 = smov 96   ;;  %s1495_s21 = smov 88  }
   0x9   :  { %1399 = vmatpush3.bf16.msra.mxu1 %v1398_v10  ;;  %s1496_s22 = smov 120   ;;  %s1497_s23 = smov 80  }
   0xa   :  { %1313 = vmatprep.subr.mxu1 %v1477_v7  ;;  %s1498_s4 = smov 112   ;;  %s1499_s24 = smov 72  }
  0x92   :  { %v48_v11 = vpop.xlane.xlu0 %47 }
  0x93   :  { %v50_v12 = vmul.f32 0.03125, %v48_v11 }
  0x95   :  { %v51_v13 = vadd.f32 1e-06, %v50_v12 }
  0x97   :  { %1451 = vrsqrt.f32 %v51_v13 }
  0xa1   :  { %v1452_v14 = vpop.eup %1451 }
  0xa2   :  { %v53_v16 = vmul.f32 %v1452_v14, %v1560_v0 }
  0xa4   :  { %v60_v17 = vmul.f32 %v1242_v15, %v53_v16 }
  0xa6   :  { %1311 = vmatmul.mubr.msk.f32.vlgmr.msra.gmra.mrb[0].mxu1 %vm45_vm0, %v60_v17 }
  0xa7   :  { %1315 = vmatprep.mubr.msk.f32.mxu1 %vm1476_vm1, %v1477_v7 }
 0x179   :  { %v141_v19 = vpop.f32.mrb[0].mxu1 }
 0x17a   :  { %v1595_v20 = vadd.f32 %v1243_v18, %v141_v19  ;;  %v1312_v21 = vpop.f32.mrb[1].mxu1 }
 0x17c   :  { %167 = vrot.lane.b32.xlu1 %v1595_v20, %s1478_s25  ;;  %v1599_v22 = vsub.f32 0.0, %v1595_v20 }
 0x17e   :  { %164 = vrot.lane.b32.xlu0 %v1599_v22, %s1479_s3 }
 0x180   :  { %369 = vrot.lane.b32.xlu1 %v1595_v20, %s1479_s3  ;;  %s1501_s3 = smov 64  }
 0x182   :  { %552 = vrot.lane.b32.xlu0 %v1599_v22, %s1480_s26 }
 0x184   :  { %352 = vrot.lane.b32.xlu1 %v1595_v20, %s1481_s27 }
 0x186   :  { %772 = vrot.lane.b32.xlu0 %v1599_v22, %s1482_s5 }
 0x188   :  { %572 = vrot.lane.b32.xlu1 %v1595_v20, %s1483_s28 }
 0x18a   :  { %755 = vrot.lane.b32.xlu0 %v1599_v22, %s1478_s25  ;;  %s1500_s25 = smov 104  }
 0x18c   :  { %555 = vrot.lane.b32.xlu1 %v1595_v20, %s1484_s29 }
 0x18e   :  { %160 = vrot.lane.b32.xlu0 %v1613_v23, %s1485_s12 }
 0x190   :  { %366 = vrot.lane.b32.xlu1 %v1599_v22, %s1483_s28 }
 0x192   :  { %362 = vrot.lane.b32.xlu0 %v1613_v23, %s1486_s13 }
 0x194   :  { %349 = vrot.lane.b32.xlu1 %v1599_v22, %s1484_s29 }
 0x196   :  { %345 = vrot.lane.b32.xlu0 %v1613_v23, %s1487_s14 }
 0x198   :  { %569 = vrot.lane.b32.xlu1 %v1599_v22, %s1488_s15 }
 0x19a   :  { %548 = vrot.lane.b32.xlu0 %v1613_v23, %s1489_s1 }
 0x19c   :  { %775 = vrot.lane.b32.xlu1 %v1595_v20, %s1488_s15 }
 0x1a0   :  { %758 = vrot.lane.b32.xlu1 %v1595_v20, %s1480_s26 }
 0x1a4   :  { %565 = vrot.lane.b32.xlu1 %v1613_v23, %s1490_s16 }
 0x1a8   :  { %768 = vrot.lane.b32.xlu1 %v1613_v23, %s1491_s17 }
 0x1ee   :  { %v168_v24 = vpop.permute.xlu1 %167 }
 0x1f0   :  { %v165_v26 = vpop.permute.xlu0 %164 }
 0x1f1   :  { %v170_v27 = vsel %vm155_vm2, %v165_v26, %v168_v24 }
 0x1f2   :  { %v171_v28 = vmul.f32 %v170_v27, %v1634_v25  ;;  %v370_v29 = vpop.permute.xlu1 %369  ;;  %v145_v27 = vmul.f32 %v1595_v20, %v1613_v23 }
 0x1f4   :  { %173 = vrot.lane.b32.xlu1 %v171_v28, %s1485_s12  ;;  %v553_v36 = vpop.permute.xlu0 %552 }
 0x1f6   :  { %v353_v30 = vpop.permute.xlu1 %352 }
 0x1f8   :  { %v773_v43 = vpop.permute.xlu0 %772 }
 0x1fa   :  { %v573_v31 = vpop.permute.xlu1 %572 }
 0x1fc   :  { %v756_v49 = vpop.permute.xlu0 %755 }
 0x1fe   :  { %v556_v32 = vpop.permute.xlu1 %555 }
 0x1ff   :  { %v558_v40 = vsel %vm155_vm2, %v553_v36, %v556_v32 }
 0x200   :  { %v559_v44 = vmul.f32 %v558_v40, %v1634_v25  ;;  %v161_v54 = vpop.permute.xlu0 %160 }
 0x201   :  { %v163_v56 = vmul.f32 %v161_v54, %v1595_v20 }
 0x202   :  { %v367_v33 = vpop.permute.xlu1 %366 }
 0x203   :  { %v372_v34 = vsel %vm155_vm2, %v367_v33, %v370_v29 }
 0x204   :  { %v373_v35 = vmul.f32 %v372_v34, %v1634_v25  ;;  %v363_v59 = vpop.permute.xlu0 %362  ;;  %v38_v34 = vlaneseq }
 0x205   :  { %v365_v61 = vmul.f32 %v363_v59, %v1595_v20 }
 0x206   :  { %v350_v37 = vpop.permute.xlu1 %349  ;;  %375 = vrot.lane.b32.xlu1 %v373_v35, %s1486_s13  ;;  %v39_v35 = vshrl.u32 %v38_v34, 7  ;;  %v41_v36 = vand.u32 127, %v38_v34  ;;  %v971_v34 = vld [vmem:[%s1806_s6] sm:$0xff] }
 0x207   :  { %v355_v38 = vsel %vm155_vm2, %v350_v37, %v353_v30 }
 0x208   :  { %v356_v39 = vmul.f32 %v355_v38, %v1634_v25  ;;  %v346_v60 = vpop.permute.xlu0 %345  ;;  %vm42_vm4 = vcmp.ge.s32.totalorder %v39_v35, %v41_v36  ;;  %v972_v35 = vld [vmem:[%s1806_s6 + $0x8] sm:$0xff] }
 0x209   :  { %v348_v2 = vmul.f32 %v346_v60, %v1595_v20  ;;  %v1401_v36 = vpack.c.bf16 %v972_v35, %v971_v34 }
 0x20a   :  { %v570_v41 = vpop.permute.xlu1 %569  ;;  %358 = vrot.lane.b32.xlu0 %v356_v39, %s1487_s14 }
 0x20b   :  { %v575_v42 = vsel %vm155_vm2, %v570_v41, %v573_v31 }
 0x20c   :  { %v576_v45 = vmul.f32 %v575_v42, %v1634_v25  ;;  %v549_v62 = vpop.permute.xlu0 %548 }
 0x20d   :  { %v551_v6 = vmul.f32 %v549_v62, %v1595_v20 }
 0x20e   :  { %v776_v46 = vpop.permute.xlu1 %775  ;;  %578 = vrot.lane.b32.xlu1 %v576_v45, %s1490_s16  ;;  %561 = vrot.lane.b32.xlu0 %v559_v44, %s1489_s1 }
 0x20f   :  { %v778_v47 = vsel %vm155_vm2, %v773_v43, %v776_v46 }
 0x210   :  { %v779_v48 = vmul.f32 %v778_v47, %v1634_v25 }
 0x212   :  { %v759_v50 = vpop.permute.xlu1 %758  ;;  %751 = vrot.lane.b32.xlu0 %v1613_v23, %s1492_s2  ;;  %781 = vrot.lane.b32.xlu1 %v779_v48, %s1491_s17 }
 0x213   :  { %v761_v51 = vsel %vm155_vm2, %v756_v49, %v759_v50 }
 0x214   :  { %v762_v52 = vmul.f32 %v761_v51, %v1634_v25 }
 0x216   :  { %148 = vrot.lane.b32.xlu0 %v1599_v22, %s1481_s27  ;;  %764 = vrot.lane.b32.xlu1 %v762_v52, %s1492_s2  ;;  %v566_v53 = vpop.permute.xlu1 %565 }
 0x217   :  { %v568_v8 = vmul.f32 %v566_v53, %v1595_v20 }
 0x21a   :  { %152 = vrot.lane.b32.xlu1 %v1595_v20, %s1493_s19  ;;  %v769_v55 = vpop.permute.xlu1 %768 }
 0x21b   :  { %v771_v13 = vmul.f32 %v769_v55, %v1595_v20 }
 0x266   :  { %v174_v57 = vpop.permute.xlu1 %173 }
 0x267   :  { %v176_v58 = vadd.f32 %v174_v57, %v163_v56 }
 0x269   :  { %178 = vrot.lane.b32.xlu0 %v176_v58, %s1494_s20 }
 0x278   :  { %v376_v63 = vpop.permute.xlu1 %375 }
 0x279   :  { %v378_v1 = vadd.f32 %v376_v63, %v365_v61 }
 0x27b   :  { %383 = vrot.lane.b32.xlu1 %v378_v1, %s1495_s21 }
 0x27c   :  { %v359_v4 = vpop.permute.xlu0 %358 }
 0x27d   :  { %v361_v5 = vadd.f32 %v359_v4, %v348_v2 }
 0x27f   :  { %380 = vrot.lane.b32.xlu0 %v361_v5, %s1496_s22 }
 0x280   :  { %v579_v9 = vpop.permute.xlu1 %578  ;;  %v562_v10 = vpop.permute.xlu0 %561 }
 0x281   :  { %v581_v11 = vadd.f32 %v579_v9, %v568_v8  ;;  %v564_v12 = vadd.f32 %v562_v10, %v551_v6 }
 0x283   :  { %586 = vrot.lane.b32.xlu1 %v581_v11, %s1497_s23  ;;  %583 = vrot.lane.b32.xlu0 %v564_v12, %s1498_s4 }
 0x284   :  { %v782_v14 = vpop.permute.xlu1 %781  ;;  %v752_v15 = vpop.permute.xlu0 %751 }
 0x285   :  { %v784_v16 = vadd.f32 %v782_v14, %v771_v13  ;;  %v754_v17 = vmul.f32 %v752_v15, %v1595_v20 }
 0x287   :  { %789 = vrot.lane.b32.xlu1 %v784_v16, %s1499_s24 }
 0x288   :  { %v765_v18 = vpop.permute.xlu1 %764  ;;  %v149_v22 = vpop.permute.xlu0 %148 }
 0x289   :  { %v767_v19 = vadd.f32 %v765_v18, %v754_v17 }
 0x28b   :  { %786 = vrot.lane.b32.xlu0 %v767_v19, %s1500_s25 }
 0x28c   :  { %v153_v21 = vpop.permute.xlu1 %152 }
 0x28d   :  { %v156_v24 = vsel %vm155_vm2, %v149_v22, %v153_v21 }
 0x28e   :  { %v157_v26 = vmul.f32 %v156_v24, %v1634_v25 }
 0x290   :  { %v158_v29 = vadd.f32 %v157_v26, %v145_v27 }
 0x2db   :  { %v179_v28 = vpop.permute.xlu0 %178 }
 0x2dc   :  { %1314 = vmatpush3.xpose.msk.msra.mxu1 %vm180_vm3, %v179_v28 }
 0x2dd   :  { %1318 = vmatprep.subr.mxu1 %v1477_v7 }
 0x2df   :  { %1316 = vmatmul.mubr.msk.f32.vlgmr.msra.gmra.mrb[2].mxu1 %vm180_vm3, %v158_v29 }
 0x2e0   :  { %1320 = vmatprep.mubr.msk.f32.mxu1 %vm1476_vm1, %v1477_v7 }
 0x2ed   :  { %v384_v30 = vpop.permute.xlu1 %383 }
 0x2ee   :  { %1324 = vmatpush3.xpose.msk.msra.mxu0 %vm180_vm3, %v384_v30 }
 0x2ef   :  { %1333 = vmatprep.subr.mxu0 %v1477_v7 }
 0x2f1   :  { %v381_v25 = vpop.permute.xlu0 %380 }
 0x2f2   :  { %1326 = vmatmul.mubr.msk.f32.vlgmr.msra.gmra.mrb[0].mxu0 %vm180_vm3, %v381_v25 }
 0x2f3   :  { %1335 = vmatprep.mubr.msk.f32.mxu0 %vm1476_vm1, %v1477_v7 }
 0x2f5   :  { %v587_v23 = vpop.permute.xlu1 %586  ;;  %v584_v31 = vpop.permute.xlu0 %583 }
 0x2f6   :  { %1334 = vmatpush3.xpose.msk.msra.mxu0 %vm180_vm3, %v587_v23 }
 0x2f7   :  { %1343 = vmatprep.subr.mxu0 %v1477_v7 }
 0x2f9   :  { %v790_v32 = vpop.permute.xlu1 %789  ;;  %1336 = vmatmul.mubr.msk.f32.vlgmr.msra.gmra.mrb[2].mxu0 %vm180_vm3, %v584_v31 }
 0x2fa   :  { %1344 = vmatpush3.xpose.msk.msra.mxu0 %vm180_vm3, %v790_v32  ;;  %1345 = vmatprep.mubr.msk.f32.mxu0 %vm1476_vm1, %v1477_v7 }
 0x2fb   :  { %1400 = vmatprep.subr.bf16.mxu0 %v1475_v3 }
 0x2fd   :  { %v787_v33 = vpop.permute.xlu0 %786 }
 0x2fe   :  { %1346 = vmatmul.mubr.msk.f32.vlgmr.msra.gmra.mrb[4].mxu0 %vm180_vm3, %v787_v33 }
 0x2ff   :  { %1361 = vmatprep.mubr.msk.f32.mxu0 %vm1476_vm1, %v1477_v7  ;;  %1402 = vmatpush3.bf16.msra.mxu0 %v1401_v36 }
 0x300   :  { %1403 = vmatprep.subr.bf16.mxu0 %v1475_v3 }
 0x3b2   :  { %v252_v37 = vpop.f32.mrb[2].mxu1 }
 0x3b3   :  { %v256_v38 = vmul.f32 0.35355338, %v252_v37  ;;  %v1317_v39 = vpop.f32.mrb[3].mxu1 }
 0x3b4   :  { %v973_v39 = vld [vmem:[%s1806_s6 + $0x10] sm:$0xff] }
 0x3b5   :  { %v257_v40 = vsel %vm42_vm4, %v256_v38, -1e+30 }
 0x3b6   :  { %v258_v41 = vsel %vm180_vm3, %v257_v40, -inf }
 0x3b7   :  { %259 = vmax.xlane.f32.xlu1 %v258_v41 }
 0x3c5   :  { %v455_v42 = vpop.f32.mrb[0].mxu0 }
 0x3c6   :  { %v459_v43 = vmul.f32 0.35355338, %v455_v42  ;;  %v1327_v44 = vpop.f32.mrb[1].mxu0 }
 0x3c8   :  { %v460_v45 = vsel %vm42_vm4, %v459_v43, -1e+30 }
 0x3c9   :  { %v461_v46 = vsel %vm180_vm3, %v460_v45, -inf }
 0x3ca   :  { %462 = vmax.xlane.f32.xlu0 %v461_v46 }
 0x3cc   :  { %v658_v47 = vpop.f32.mrb[2].mxu0 }
 0x3cd   :  { %v662_v48 = vmul.f32 0.35355338, %v658_v47  ;;  %v1337_v49 = vpop.f32.mrb[3].mxu0 }
 0x3cf   :  { %v663_v50 = vsel %vm42_vm4, %v662_v48, -1e+30 }
 0x3d0   :  { %v664_v51 = vsel %vm180_vm3, %v663_v50, -inf }
 0x3d1   :  { %665 = vmax.xlane.f32.xlu0 %v664_v51  ;;  %v861_v52 = vpop.f32.mrb[4].mxu0 }
 0x3d2   :  { %v865_v53 = vmul.f32 0.35355338, %v861_v52  ;;  %v1347_v54 = vpop.f32.mrb[5].mxu0 }
 0x3d4   :  { %v866_v55 = vsel %vm42_vm4, %v865_v53, -1e+30 }
 0x3d5   :  { %v867_v56 = vsel %vm180_vm3, %v866_v55, -inf }
 0x3d6   :  { %868 = vmax.xlane.f32.xlu1 %v867_v56 }
 0x3e7   :  { %472 = vrot.lane.b32.xlu1 %v1595_v20, %s1491_s17 }
 0x444   :  { %v260_v57 = vpop.xlane.xlu1 %259 }
 0x445   :  { %v261_v58 = vsub.f32 %v257_v40, %v260_v57  ;;  %v974_v40 = vld [vmem:[%s1806_s6 + $0x18] sm:$0xff]  ;;  %v1065_v57 = vld [vmem:[%s1807_s8] sm:$0xff] }
 0x446   :  { %v1404_v41 = vpack.c.bf16 %v974_v40, %v973_v39 }
 0x447   :  { %v262_v59 = vmul.f32 1.442695, %v261_v58  ;;  %v1066_v58 = vld [vmem:[%s1807_s8 + $0x8] sm:$0xff] }
 0x448   :  { %1405 = vmatpush3.bf16.msra.mxu0 %v1404_v41 }
 0x449   :  { %1453 = vpow2.f32 %v262_v59  ;;  %1412 = vmatprep.subr.bf16.mxu0 %v1475_v3  ;;  %v1407_v59 = vpack.c.bf16 %v1066_v58, %v1065_v57 }
 0x453   :  { %v1454_v60 = vpop.eup %1453 }
 0x454   :  { %v264_v61 = vsel %vm180_vm3, %v1454_v60, 0.0 }
 0x455   :  { %265 = vadd.xlane.f32.xlu0 %v264_v61 }
 0x457   :  { %v463_v62 = vpop.xlane.xlu0 %462 }
 0x458   :  { %v464_v63 = vsub.f32 %v460_v45, %v463_v62 }
 0x45a   :  { %v465_v1 = vmul.f32 1.442695, %v464_v63 }
 0x45c   :  { %1455 = vpow2.f32 %v465_v1 }
 0x45e   :  { %v666_v9 = vpop.xlane.xlu0 %665 }
 0x45f   :  { %v667_v12 = vsub.f32 %v663_v50, %v666_v9  ;;  %v1156_v9 = vld [vmem:[%s1809_s9 + $0x10] sm:$0xff] }
 0x461   :  { %v668_v13 = vmul.f32 1.442695, %v667_v12 }
 0x463   :  { %v869_v2 = vpop.xlane.xlu1 %868 }
 0x464   :  { %v870_v4 = vsub.f32 %v866_v55, %v869_v2  ;;  %v1258_v2 = vld [vmem:[%s1808_s7] ss:$0 sm:$0xff] }
 0x466   :  { %v1456_v5 = vpop.eup %1455  ;;  %v871_v6 = vmul.f32 1.442695, %v870_v4 }
 0x467   :  { %v467_v8 = vsel %vm180_vm3, %v1456_v5, 0.0  ;;  %v473_v21 = vpop.permute.xlu1 %472 }
 0x468   :  { %1457 = vpow2.f32 %v871_v6  ;;  %468 = vadd.xlane.f32.xlu1 %v467_v8  ;;  %v1154_v6 = vld [vmem:[%s1809_s9] sm:$0xff]  ;;  %v1155_v8 = vld [vmem:[%s1809_s9 + $0x8] sm:$0xff] }
 0x469   :  { %1459 = vpow2.f32 %v668_v13  ;;  %v1158_v13 = vld [vmem:[%s1809_s9 + $0x20] sm:$0xff] }
 0x46b   :  { %269 = vrot.lane.b32.xlu0 %v1595_v20, %s1501_s3 }
 0x472   :  { %v1458_v10 = vpop.eup %1457 }
 0x473   :  { %v873_v11 = vsel %vm180_vm3, %v1458_v10, 0.0  ;;  %v1460_v14 = vpop.eup %1459 }
 0x474   :  { %874 = vadd.xlane.f32.xlu1 %v873_v11  ;;  %v670_v15 = vsel %vm180_vm3, %v1460_v14, 0.0  ;;  %v1157_v11 = vld [vmem:[%s1809_s9 + $0x18] sm:$0xff] }
 0x475   :  { %v1416_v12 = vpack.c.bf16 %v1157_v11, %v1156_v9 }
 0x485   :  { %675 = vrot.lane.b32.xlu1 %v1595_v20, %s1490_s16 }
 0x48a   :  { %671 = vadd.xlane.f32.xlu0 %v670_v15 }
 0x4a0   :  { %878 = vrot.lane.b32.xlu0 %v1595_v20, %s1486_s13 }
 0x4e2   :  { %v266_v16 = vpop.xlane.xlu0 %265 }
 0x4e3   :  { %1461 = vrcp.f32 %v266_v16  ;;  %v1160_v16 = vld [vmem:[%s1809_s9 + $0x30] sm:$0xff] }
 0x4e6   :  { %v270_v17 = vpop.permute.xlu0 %269 }
 0x4e7   :  { %1319 = vmatpush3.msra.mxu1 %v270_v17  ;;  %v1161_v17 = vld [vmem:[%s1809_s9 + $0x38] sm:$0xff] }
 0x4e8   :  { %1328 = vmatprep.subr.mxu1 %v1477_v7 }
 0x4ed   :  { %v1462_v18 = vpop.eup %1461 }
 0x4ee   :  { %v268_v19 = vmul.f32 %v1462_v18, %v1454_v60  ;;  %v1422_v18 = vpack.c.bf16 %v1161_v17, %v1160_v16 }
 0x4f0   :  { %1321 = vmatmul.mubr.msk.f32.vlgmr.msra.gmra.mrb[4].mxu1 %vm180_vm3, %v268_v19 }
 0x4f1   :  { %1329 = vmatpush3.msra.mxu1 %v473_v21  ;;  %1330 = vmatprep.mubr.msk.f32.mxu1 %vm1476_vm1, %v1477_v7 }
 0x4f2   :  { %1338 = vmatprep.subr.mxu1 %v1477_v7 }
 0x4f5   :  { %v469_v22 = vpop.xlane.xlu1 %468 }
 0x4f6   :  { %1463 = vrcp.f32 %v469_v22 }
 0x500   :  { %v1464_v20 = vpop.eup %1463 }
 0x501   :  { %v471_v24 = vmul.f32 %v1464_v20, %v1456_v5  ;;  %v875_v26 = vpop.xlane.xlu1 %874 }
 0x503   :  { %1331 = vmatmul.mubr.msk.f32.vlgmr.msra.gmra.mrb[6].mxu1 %vm180_vm3, %v471_v24 }
 0x504   :  { %1340 = vmatprep.mubr.msk.f32.mxu1 %vm1476_vm1, %v1477_v7 }
 0x505   :  { %v676_v27 = vpop.permute.xlu1 %675 }
 0x506   :  { %1339 = vmatpush3.msra.mxu1 %v676_v27 }
 0x507   :  { %1348 = vmatprep.subr.mxu1 %v1477_v7 }
 0x517   :  { %v672_v28 = vpop.xlane.xlu0 %671 }
 0x518   :  { %1465 = vrcp.f32 %v672_v28 }
 0x519   :  { %1467 = vrcp.f32 %v875_v26 }
 0x51b   :  { %v879_v23 = vpop.permute.xlu0 %878 }
 0x522   :  { %v1466_v29 = vpop.eup %1465 }
 0x523   :  { %v674_v30 = vmul.f32 %v1466_v29, %v1460_v14  ;;  %v1468_v25 = vpop.eup %1467  ;;  %v1159_v14 = vld [vmem:[%s1809_s9 + $0x28] sm:$0xff] }
 0x524   :  { %v877_v31 = vmul.f32 %v1468_v25, %v1458_v10  ;;  %v1413_v10 = vpack.c.bf16 %v1155_v8, %v1154_v6  ;;  %v1419_v15 = vpack.c.bf16 %v1159_v14, %v1158_v13 }
 0x525   :  { %1341 = vmatmul.mubr.msk.f32.vlgmr.msra.gmra.mrb[8].mxu1 %vm180_vm3, %v674_v30 }
 0x526   :  { %1349 = vmatpush3.msra.mxu1 %v879_v23  ;;  %1350 = vmatprep.mubr.msk.f32.mxu1 %vm1476_vm1, %v1477_v7 }
 0x527   :  { %1406 = vmatprep.subr.bf16.mxu1 %v1475_v3 }
 0x529   :  { %1351 = vmatmul.mubr.msk.f32.vlgmr.msra.gmra.mrb[10].mxu1 %vm180_vm3, %v877_v31 }
 0x52a   :  { %1372 = vmatprep.mubr.msk.f32.mxu1 %vm1476_vm1, %v1477_v7  ;;  %1408 = vmatpush3.bf16.msra.mxu1 %v1407_v59 }
 0x52b   :  { %1409 = vmatprep.subr.bf16.mxu1 %v1475_v3 }
 0x5c3   :  { %v341_v32 = vpop.f32.mrb[4].mxu1 }
 0x5c4   :  { %v1322_v33 = vpop.f32.mrb[5].mxu1 }
 0x5d6   :  { %v544_v37 = vpop.f32.mrb[6].mxu1 }
 0x5d7   :  { %955 = vrot.lane.b32.xlu1 %v544_v37, %s1487_s14  ;;  %v1332_v38 = vpop.f32.mrb[7].mxu1 }
 0x5f8   :  { %v747_v42 = vpop.f32.mrb[8].mxu1 }
 0x5f9   :  { %959 = vrot.lane.b32.xlu0 %v747_v42, %s1489_s1  ;;  %v1342_v43 = vpop.f32.mrb[9].mxu1 }
 0x5fc   :  { %v950_v44 = vpop.f32.mrb[10].mxu1 }
 0x5fd   :  { %963 = vrot.lane.b32.xlu1 %v950_v44, %s1492_s2  ;;  %v1352_v45 = vpop.f32.mrb[11].mxu1 }
 0x649   :  { %v956_v46 = vpop.permute.xlu1 %955 }
 0x64a   :  { %v966_v48 = vsel %vm180_vm3, %v341_v32, %v956_v46 }
 0x66b   :  { %v960_v47 = vpop.permute.xlu0 %959 }
 0x66c   :  { %v968_v49 = vsel %vm967_vm5, %v966_v48, %v960_v47 }
 0x66f   :  { %v964_v50 = vpop.permute.xlu1 %963 }
 0x670   :  { %v970_v51 = vsel %vm969_vm6, %v968_v49, %v964_v50 }
 0x671   :  { %1362 = vmatmul.mubr.msk.f32.vlgmr.msra.gmra.mrb[6].mxu0 %vm45_vm0, %v970_v51 }
 0x672   :  { %1391 = vmatprep.mubr.msk.f32.mxu0 %vm1476_vm1, %v1477_v7  ;;  %v1068_v7 = vld [vmem:[%s1807_s8 + $0x18] sm:$0xff]  ;;  %1414 = vmatpush3.bf16.msra.mxu0 %v1413_v10 }
 0x673   :  { %1415 = vmatprep.subr.bf16.mxu0 %v1475_v3 }
 0x676   :  { %1417 = vmatpush3.bf16.msra.mxu0 %v1416_v12 }
 0x677   :  { %1418 = vmatprep.subr.bf16.mxu0 %v1475_v3 }
 0x67a   :  { %1420 = vmatpush3.bf16.msra.mxu0 %v1419_v15 }
 0x67b   :  { %1421 = vmatprep.subr.bf16.mxu0 %v1475_v3 }
 0x67e   :  { %1423 = vmatpush3.bf16.msra.mxu0 %v1422_v18 }
 0x744   :  { %v1044_v52 = vpop.f32.mrb[6].mxu0 }
 0x745   :  { %v1048_v53 = vadd.f32 %v1044_v52, %v1560_v0  ;;  %v1363_v54 = vpop.f32.mrb[7].mxu0  ;;  %v1067_v0 = vld [vmem:[%s1807_s8 + $0x10] sm:$0xff] }
 0x746   :  { %v1410_v60 = vpack.c.bf16 %v1068_v7, %v1067_v0 }
 0x747   :  { %v1050_v55 = vmul.f32 %v1048_v53, %v1048_v53 }
 0x748   :  { %1411 = vmatpush3.bf16.msra.mxu1 %v1410_v60 }
 0x749   :  { %v1051_v56 = vsel %vm45_vm0, %v1050_v55, 0.0 }
 0x74a   :  { %1052 = vadd.xlane.f32.xlu0 %v1051_v56 }
 0x7d7   :  { %v1053_v61 = vpop.xlane.xlu0 %1052 }
 0x7d8   :  { %v1054_v62 = vmul.f32 0.03125, %v1053_v61 }
 0x7da   :  { %v1055_v63 = vadd.f32 1e-06, %v1054_v62 }
 0x7dc   :  { %1469 = vrsqrt.f32 %v1055_v63 }
 0x7e6   :  { %v1470_v1 = vpop.eup %1469 }
 0x7e7   :  { %v1057_v4 = vmul.f32 %v1470_v1, %v1048_v53 }
 0x7e9   :  { %v1064_v5 = vmul.f32 %v1258_v2, %v1057_v4 }
 0x7eb   :  { %1373 = vmatmul.mubr.msk.f32.vlgmr.msra.gmra.mrb[12].mxu1 %vm45_vm0, %v1064_v5 }
 0x8be   :  { %v1138_v19 = vpop.f32.mrb[12].mxu1 }
 0x8bf   :  { %1150 = vrot.lane.b32.xlu1 %v1138_v19, %s1501_s3  ;;  %v1374_v21 = vpop.f32.mrb[13].mxu1  ;;  %v1260_v22 = vmul.f32 -1.442695, %v1138_v19 }
 0x8c1   :  { %1471 = vpow2.f32 %v1260_v22 }
 0x8cb   :  { %v1472_v20 = vpop.eup %1471 }
 0x8cc   :  { %v1145_v24 = vadd.f32 1.0, %v1472_v20 }
 0x8ce   :  { %1473 = vrcp.f32 %v1145_v24 }
 0x8d8   :  { %v1474_v26 = vpop.eup %1473 }
 0x8d9   :  { %v1148_v27 = vmul.f32 %v1474_v26, %v1138_v19 }
 0x931   :  { %v1151_v28 = vpop.permute.xlu1 %1150 }
 0x932   :  { %v1153_v29 = vmul.f32 %v1151_v28, %v1148_v27 }
 0x934   :  { %1392 = vmatmul.mubr.msk.f32.vlgmr.msra.gmra.mrb[8].mxu0 %vm1162_vm7, %v1153_v29 }
 0xa07   :  { %v1232_v30 = vpop.f32.mrb[8].mxu0 }
 0xa08   :  { %v1236_v25 = vadd.f32 %v1232_v30, %v1048_v53  ;;  %v1393_v23 = vpop.f32.mrb[9].mxu0 }
 0xa0a   :  { %1237 = vst.msk [vmem:[%s1810_s10] sm:$0xff] %vm45_vm0, %v1236_v25 }

</bundles_post_ra>
